<compile_context>
chip_gen: v7x
topology: tpu7x:2x2x1
jax: 0.10.0
libtpu: 0.0.40
codegen_flags: <defaults>
</compile_context>

<pallas_src>
import math

import jax
import jax.numpy as jnp
from jax.experimental import pallas as pl
from jax.experimental.pallas import tpu as pltpu

LANE = 128
_VMEM_LIMIT = 48 * 1024 * 1024          # fits v5e/v6e (128 MiB) and v7x (64 MiB)
_FUSED_BYTES_BUDGET = 24 * 1024 * 1024  # resident-working-set threshold for fused path


def _round_up(x, m):
    return (x + m - 1) // m * m


def _pad2(a, rows, cols, dtype):
    return jnp.zeros((rows, cols), dtype).at[:a.shape[0], :a.shape[1]].set(a.astype(dtype))


def _normalized_adjacency_bf16(edge_index, n):
    """Dense symmetric-normalized adjacency with self-loops, cast to bf16."""
    src, dst = edge_index[0], edge_index[1]
    adj = jnp.zeros((n, n), jnp.float32).at[src, dst].set(1.0)
    diag = jnp.arange(n)
    adj = adj.at[diag, diag].set(1.0)            # self-loops (no double counting)
    deg = jnp.sum(adj, axis=1)
    dinv = jnp.where(deg > 0, jax.lax.rsqrt(deg), 0.0)
    return (adj * dinv[:, None] * dinv[None, :]).astype(jnp.bfloat16)


# ----------------------- fused small-N kernel (grid=(1,)) -----------------------
def _fused_kernel(a_ref, x_ref, mask_ref, w1_ref, b1_ref, w2_ref, b2_ref,
                  w3_ref, b3_ref, w4_ref, b4_ref, recon_ref, z_ref):
    f32 = jnp.float32
    bf16 = jnp.bfloat16
    t1 = jnp.dot(a_ref[...], x_ref[...], preferred_element_type=f32)
    h1 = jnp.maximum(
        jnp.dot(t1.astype(bf16), w1_ref[...], preferred_element_type=f32)
        + b1_ref[...], 0.0)
    t2 = jnp.dot(a_ref[...], h1.astype(bf16), preferred_element_type=f32)
    z = (jnp.dot(t2.astype(bf16), w2_ref[...], preferred_element_type=f32)
         + b2_ref[...]) * mask_ref[...]
    z_ref[...] = z
    d1 = jnp.maximum(
        jnp.dot(z, w3_ref[...].astype(f32), preferred_element_type=f32)
        + b3_ref[...], 0.0)
    recon_ref[...] = (jnp.dot(d1, w4_ref[...].astype(f32), preferred_element_type=f32)
                      + b4_ref[...])


# --------------------------- tiled pass 1: GCN layer 1 ---------------------------
def _gcn1_kernel(bcols_ref, bcnt_ref, a_ref, x_ref, w1_ref, b1_ref, h1_ref, acc_ref):
    """h1 = relu((A @ x) @ W1 + b1); grid = (row tiles, A column-block walk)."""
    i = pl.program_id(0)
    k = pl.program_id(1)
    tk = a_ref.shape[1]

    @pl.when(k == 0)
    def _():
        acc_ref[...] = jnp.zeros_like(acc_ref)

    @pl.when(k < bcnt_ref[i])            # skip all-zero A blocks (block-sparse walk)
    def _():
        kb = bcols_ref[i, k]
        start = pl.multiple_of(kb * tk, tk)
        acc_ref[...] += jnp.dot(a_ref[...], x_ref[pl.ds(start, tk), :],
                                preferred_element_type=jnp.float32)

    @pl.when(k == pl.num_programs(1) - 1)
    def _():
        # 128-row sub-blocks keep the epilogue's live vregs bounded at larger tm.
        for r in range(acc_ref.shape[0] // 128):
            rs = pl.ds(r * 128, 128)
            h1 = jnp.dot(acc_ref[rs, :].astype(jnp.bfloat16), w1_ref[...],
                         preferred_element_type=jnp.float32) + b1_ref[...]
            h1_ref[rs, :] = jnp.maximum(h1, 0.0).astype(h1_ref.dtype)


# ----------------- tiled pass 2: GCN layer 2 + mask + MLP decoder -----------------
def _gcn2_dec_kernel(bcols_ref, bcnt_ref, a_ref, h1_ref, mask_ref,
                     w2_ref, b2_ref, w3_ref, b3_ref, w4_ref, b4_ref,
                     recon_ref, z_ref, acc_ref):
    """z = ((A @ h1) @ W2 + b2) * mask; recon = relu(z @ W3 + b3) @ W4 + b4."""
    i = pl.program_id(0)
    k = pl.program_id(1)
    tk = a_ref.shape[1]
    f32 = jnp.float32

    @pl.when(k == 0)
    def _():
        acc_ref[...] = jnp.zeros_like(acc_ref)

    @pl.when(k < bcnt_ref[i])
    def _():
        kb = bcols_ref[i, k]
        start = pl.multiple_of(kb * tk, tk)
        acc_ref[...] += jnp.dot(a_ref[...], h1_ref[pl.ds(start, tk), :],
                                preferred_element_type=f32)

    @pl.when(k == pl.num_programs(1) - 1)
    def _():
        for r in range(acc_ref.shape[0] // 128):
            rs = pl.ds(r * 128, 128)
            z = (jnp.dot(acc_ref[rs, :].astype(jnp.bfloat16), w2_ref[...],
                         preferred_element_type=f32) + b2_ref[...]) * mask_ref[rs, :]
            z_ref[rs, :] = z
            d1 = jnp.maximum(
                jnp.dot(z, w3_ref[...].astype(f32), preferred_element_type=f32)
                + b3_ref[...], 0.0)
            recon_ref[rs, :] = (jnp.dot(d1, w4_ref[...].astype(f32),
                                        preferred_element_type=f32) + b4_ref[...])


def _a_index_map(i, k, bcols, bcnt):
    # Walk only the nonzero column blocks of row block i; clamp + repeat the last
    # valid block for padded k steps so no extra DMA is issued.
    kk = jnp.maximum(jnp.minimum(k, bcnt[i] - 1), 0)
    return (i, bcols[i, kk])


def _block_structure(a_bf, n_i, tm, n_k, tk):
    """Per-row-block packed list of nonzero column blocks + counts (scalar prefetch)."""
    blk = jnp.any((a_bf != 0).reshape(n_i, tm, n_k, tk), axis=(1, 3))   # [n_i, n_k]
    bcnt = jnp.sum(blk, axis=1).astype(jnp.int32)
    cols = jnp.broadcast_to(jnp.arange(n_k, dtype=jnp.int32), (n_i, n_k))
    keys = jnp.where(blk, cols, cols + n_k)
    packed = (jnp.sort(keys, axis=1) % n_k).astype(jnp.int32)           # nnz blocks first
    pos = jnp.minimum(jnp.arange(n_k, dtype=jnp.int32)[None, :],
                      jnp.maximum(bcnt - 1, 0)[:, None])
    bcols = jnp.take_along_axis(packed, pos, axis=1)                    # pad = repeat last
    return bcols, bcnt


# -------------------------------- path: fused --------------------------------
def _forward_fused(a_nbf, x, frame_mask, params, N, F, Z, Fp, Hp, Zp):
    bf16, f32 = jnp.bfloat16, jnp.float32
    Np = _round_up(N, LANE)

    a_bf = jnp.zeros((Np, Np), bf16).at[:N, :N].set(a_nbf)
    x_bf = jnp.zeros((Np, Fp), bf16).at[:N, :F].set(x.astype(bf16))
    mask = jnp.zeros((Np, Zp), f32).at[:N, :].set(
        jnp.broadcast_to(frame_mask.astype(f32)[:, None], (N, Zp)))

    w1 = _pad2(params["w1"], Fp, Hp, bf16); b1 = _pad2(params["b1"].reshape(1, -1), 1, Hp, f32)
    w2 = _pad2(params["w2"], Hp, Zp, bf16); b2 = _pad2(params["b2"].reshape(1, -1), 1, Zp, f32)
    w3 = _pad2(params["w3"], Zp, Hp, bf16); b3 = _pad2(params["b3"].reshape(1, -1), 1, Hp, f32)
    w4 = _pad2(params["w4"], Hp, Fp, bf16); b4 = _pad2(params["b4"].reshape(1, -1), 1, Fp, f32)

    cost = pl.CostEstimate(
        flops=2 * Np * Np * (Fp + Hp) + 2 * Np * (Fp * Hp + Hp * Zp + Zp * Hp + Hp * Fp),
        transcendentals=0,
        bytes_accessed=(Np * Np * 2 + Np * (Fp * 2 + Zp * 4 + Fp * 4 + Zp * 4)
                        + 2 * (Fp * Hp + Hp * Zp + Zp * Hp + Hp * Fp)))

    full = lambda i: (0, 0)
    recon_p, z_p = pl.pallas_call(
        _fused_kernel,
        out_shape=(jax.ShapeDtypeStruct((Np, Fp), f32),
                   jax.ShapeDtypeStruct((Np, Zp), f32)),
        grid=(1,),
        in_specs=[
            pl.BlockSpec((Np, Np), full),   # A_hat (bf16), fully resident
            pl.BlockSpec((Np, Fp), full),   # x (bf16)
            pl.BlockSpec((Np, Zp), full),   # lane-dense frame mask (f32)
            pl.BlockSpec((Fp, Hp), full), pl.BlockSpec((1, Hp), full),   # W1, b1
            pl.BlockSpec((Hp, Zp), full), pl.BlockSpec((1, Zp), full),   # W2, b2
            pl.BlockSpec((Zp, Hp), full), pl.BlockSpec((1, Hp), full),   # W3, b3
            pl.BlockSpec((Hp, Fp), full), pl.BlockSpec((1, Fp), full),   # W4, b4
        ],
        out_specs=(pl.BlockSpec((Np, Fp), full), pl.BlockSpec((Np, Zp), full)),
        compiler_params=pltpu.CompilerParams(
            dimension_semantics=("arbitrary",), vmem_limit_bytes=_VMEM_LIMIT),
        cost_estimate=cost,
    )(a_bf, x_bf, mask, w1, b1, w2, b2, w3, b3, w4, b4)
    return recon_p[:N, :F], z_p[:N, :Z]


# ------------------------------- path: tiled ----------------------------------
def _forward_tiled(a_nbf, x, frame_mask, params, N, F, Z, Fp, Hp, Zp, tm, tk):
    bf16, f32 = jnp.bfloat16, jnp.float32

    # Keep >= 2 row tiles so both v7x TensorCores get work on the "parallel" axis.
    while tm > 128 and _round_up(N, math.lcm(tm, tk)) // tm < 2:
        tm //= 2
    assert tm % 128 == 0 and tk % 128 == 0, "tiles must be multiples of 128"

    Np = _round_up(N, math.lcm(tm, tk))
    n_i, n_k = Np // tm, Np // tk

    a_bf = jnp.zeros((Np, Np), bf16).at[:N, :N].set(a_nbf)
    x_bf = jnp.zeros((Np, Fp), bf16).at[:N, :F].set(x.astype(bf16))
    mask = jnp.zeros((Np, Zp), f32).at[:N, :].set(
        jnp.broadcast_to(frame_mask.astype(f32)[:, None], (N, Zp)))

    w1 = _pad2(params["w1"], Fp, Hp, bf16); b1 = _pad2(params["b1"].reshape(1, -1), 1, Hp, f32)
    w2 = _pad2(params["w2"], Hp, Zp, bf16); b2 = _pad2(params["b2"].reshape(1, -1), 1, Zp, f32)
    w3 = _pad2(params["w3"], Zp, Hp, bf16); b3 = _pad2(params["b3"].reshape(1, -1), 1, Hp, f32)
    w4 = _pad2(params["w4"], Hp, Fp, bf16); b4 = _pad2(params["b4"].reshape(1, -1), 1, Fp, f32)

    bcols, bcnt = _block_structure(a_bf, n_i, tm, n_k, tk)

    inv = lambda i, k, bc, bn: (0, 0)     # grid-invariant operands (fetched once)
    row = lambda i, k, bc, bn: (i, 0)     # per-row-tile operands

    cparams = pltpu.CompilerParams(
        dimension_semantics=("parallel", "arbitrary"),
        vmem_limit_bytes=_VMEM_LIMIT)

    # ---- pass 1: h1 = relu((A @ x) @ W1 + b1), emitted in bf16 ----
    cost1 = pl.CostEstimate(
        flops=2 * Np * Np * Fp + 2 * Np * Fp * Hp, transcendentals=0,
        bytes_accessed=Np * Np * 2 + Np * Fp * 2 + Fp * Hp * 2 + Np * Hp * 2)
    h1 = pl.pallas_call(
        _gcn1_kernel,
        out_shape=jax.ShapeDtypeStruct((Np, Hp), bf16),
        grid_spec=pltpu.PrefetchScalarGridSpec(
            num_scalar_prefetch=2,
            grid=(n_i, n_k),
            in_specs=[
                pl.BlockSpec((tm, tk), _a_index_map),   # A tile (bf16), block-sparse walk
                pl.BlockSpec((Np, Fp), inv),            # x resident, sliced in-kernel
                pl.BlockSpec((Fp, Hp), inv),            # W1 (bf16)
                pl.BlockSpec((1, Hp), inv),             # b1 (f32)
            ],
            out_specs=pl.BlockSpec((tm, Hp), row),
            scratch_shapes=[pltpu.VMEM((tm, Fp), f32)]),
        compiler_params=cparams,
        cost_estimate=cost1,
    )(bcols, bcnt, a_bf, x_bf, w1, b1)

    # ---- pass 2: GCN layer 2 (+mask) with the MLP decoder fused into the epilogue ----
    cost2 = pl.CostEstimate(
        flops=2 * Np * Np * Hp + 2 * Np * (Hp * Zp + Zp * Hp + Hp * Fp),
        transcendentals=0,
        bytes_accessed=(Np * Np * 2 + Np * Hp * 2 + Np * Zp * 4
                        + 2 * (Hp * Zp + Zp * Hp + Hp * Fp) + Np * (Fp + Zp) * 4))
    recon_p, z_p = pl.pallas_call(
        _gcn2_dec_kernel,
        out_shape=(jax.ShapeDtypeStruct((Np, Fp), f32),
                   jax.ShapeDtypeStruct((Np, Zp), f32)),
        grid_spec=pltpu.PrefetchScalarGridSpec(
            num_scalar_prefetch=2,
            grid=(n_i, n_k),
            in_specs=[
                pl.BlockSpec((tm, tk), _a_index_map),   # A tile (bf16), block-sparse walk
                pl.BlockSpec((Np, Hp), inv),            # h1 resident (bf16)
                pl.BlockSpec((tm, Zp), row),            # lane-dense frame mask
                pl.BlockSpec((Hp, Zp), inv), pl.BlockSpec((1, Zp), inv),   # W2, b2
                pl.BlockSpec((Zp, Hp), inv), pl.BlockSpec((1, Hp), inv),   # W3, b3
                pl.BlockSpec((Hp, Fp), inv), pl.BlockSpec((1, Fp), inv),   # W4, b4
            ],
            out_specs=(pl.BlockSpec((tm, Fp), row), pl.BlockSpec((tm, Zp), row)),
            scratch_shapes=[pltpu.VMEM((tm, Hp), f32)]),
        compiler_params=cparams,
        cost_estimate=cost2,
    )(bcols, bcnt, a_bf, h1, mask, w2, b2, w3, b3, w4, b4)

    return recon_p[:N, :F], z_p[:N, :Z]


# ------------------------------------ wrapper ------------------------------------
def graph_ae_forward(x, edge_index, frame_mask, params, *, tm=256, tk=512, fused=None):
    """x: [N, F] f32, edge_index: [2, E] i32, frame_mask: [N] f32/bool."""
    N, F = x.shape
    Z = params["w2"].shape[1]
    H = params["w1"].shape[1]
    Fp, Hp, Zp = (_round_up(d, LANE) for d in (F, H, Z))

    a_nbf = _normalized_adjacency_bf16(edge_index, N)

    if fused is None:
        npf = _round_up(N, LANE)
        est = (npf * npf * 2
               + npf * (Fp * 2 + Hp * 4 + Zp * 4 + Fp * 4 + Zp * 4)
               + 2 * (Fp * Hp + Hp * Zp + Zp * Hp + Hp * Fp))
        fused = est <= _FUSED_BYTES_BUDGET

    if fused:
        return _forward_fused(a_nbf, x, frame_mask, params, N, F, Z, Fp, Hp, Zp)
    return _forward_tiled(a_nbf, x, frame_mask, params, N, F, Z, Fp, Hp, Zp, tm, tk)


# ------------------------------ pure-JAX reference ------------------------------
def graph_ae_reference(x, edge_index, frame_mask, params):
    """Mirrors the kernels' mixed precision (bf16 MXU operands, f32 accumulation)."""
    bf16, f32 = jnp.bfloat16, jnp.float32
    N = x.shape[0]
    a16 = _normalized_adjacency_bf16(edge_index, N)
    x16 = x.astype(bf16)
    w1, w2, w3, w4 = (params[k].astype(bf16) for k in ("w1", "w2", "w3", "w4"))
    b1, b2, b3, b4 = (params[k].astype(f32).reshape(1, -1) for k in ("b1", "b2", "b3", "b4"))
    mask = frame_mask.astype(f32)[:, None]

    with jax.default_matmul_precision("highest"):
        t1 = jnp.dot(a16, x16, preferred_element_type=f32)
        h1 = jnp.maximum(jnp.dot(t1.astype(bf16), w1, preferred_element_type=f32) + b1, 0.0)
        t2 = jnp.dot(a16, h1.astype(bf16), preferred_element_type=f32)
        z = (jnp.dot(t2.astype(bf16), w2, preferred_element_type=f32) + b2) * mask
        d1 = jnp.maximum(jnp.dot(z, w3.astype(f32), preferred_element_type=f32) + b3, 0.0)
        recon = jnp.dot(d1, w4.astype(f32), preferred_element_type=f32) + b4
    return recon, z


def mse_loss(x, recon_x):
    # GraphAE.loss: recon_x.view(-1, recon_x.size(-1)); MSE against x
    recon_x = recon_x.reshape(-1, recon_x.shape[-1])
    return jnp.mean((recon_x - x) ** 2)


if __name__ == "__main__":
    def make_inputs(key, N, F, H, Z):
        kx, k1, k2, k3, k4, kb1, kb2, kb3, kb4 = jax.random.split(key, 9)
        x = jax.random.normal(kx, (N, F), jnp.float32)
        idx = jnp.arange(N, dtype=jnp.int32)
        nxt = (idx + 1) % N
        edge_index = jnp.stack([jnp.concatenate([idx, nxt]),
                                jnp.concatenate([nxt, idx])], axis=0)   # bidirectional ring
        frame_mask = (idx < N - N // 8).astype(jnp.float32)             # last rows = padding
        params = {
            "w1": jax.random.normal(k1, (F, H), jnp.float32) * 0.1,
            "b1": jax.random.normal(kb1, (1, H), jnp.float32) * 0.01,
            "w2": jax.random.normal(k2, (H, Z), jnp.float32) * 0.1,
            "b2": jax.random.normal(kb2, (1, Z), jnp.float32) * 0.01,
            "w3": jax.random.normal(k3, (Z, H), jnp.float32) * 0.1,
            "b3": jax.random.normal(kb3, (1, H), jnp.float32) * 0.01,
            "w4": jax.random.normal(k4, (H, F), jnp.float32) * 0.1,
            "b4": jax.random.normal(kb4, (1, F), jnp.float32) * 0.01,
        }
        return x, edge_index, frame_mask, params

    key = jax.random.PRNGKey(0)
    k_a, k_b = jax.random.split(key)
    F, H, Z = 8, 32, 16

    # --- test 1: small N -> fused single-invocation path (everything VMEM-resident) ---
    N1 = 256
    x1, ei1, fm1, p1 = make_inputs(k_a, N1, F, H, Z)
    recon1, z1 = graph_ae_forward(x1, ei1, fm1, p1)
    recon1 = jax.block_until_ready(recon1)
    z1 = jax.block_until_ready(z1)
    r_ref1, z_ref1 = graph_ae_reference(x1, ei1, fm1, p1)
    assert recon1.shape == (N1, F) and z1.shape == (N1, Z)
    assert jnp.allclose(recon1, r_ref1, atol=5e-3, rtol=5e-3), "fused recon mismatch"
    assert jnp.allclose(z1, z_ref1, atol=5e-3, rtol=5e-3), "fused latent mismatch"
    _ = jax.block_until_ready(mse_loss(x1, recon1))

    # --- test 2: tiled two-pass path with block-sparse A walk (forced) ---
    N2 = 512
    x2, ei2, fm2, p2 = make_inputs(k_b, N2, F, H, Z)
    recon2, z2 = graph_ae_forward(x2, ei2, fm2, p2, tm=128, tk=128, fused=False)
    recon2 = jax.block_until_ready(recon2)
    z2 = jax.block_until_ready(z2)
    r_ref2, z_ref2 = graph_ae_reference(x2, ei2, fm2, p2)
    assert jnp.allclose(recon2, r_ref2, atol=5e-3, rtol=5e-3), "tiled recon mismatch"
    assert jnp.allclose(z2, z_ref2, atol=5e-3, rtol=5e-3), "tiled latent mismatch"
    _ = jax.block_until_ready(mse_loss(x2, recon2))

    print("KERNEL_OK")
</pallas_src>

<mosaic_0001>
module attributes {stable_mosaic.version = 11 : i64} {
  func.func @_fused_kernel(%arg0: i32, %arg1: memref<256x256xbf16, #tpu.memory_space<vmem>>, %arg2: memref<256x128xbf16, #tpu.memory_space<vmem>>, %arg3: memref<256x128xf32, #tpu.memory_space<vmem>>, %arg4: memref<128x128xbf16, #tpu.memory_space<vmem>>, %arg5: memref<1x128xf32, #tpu.memory_space<vmem>>, %arg6: memref<128x128xbf16, #tpu.memory_space<vmem>>, %arg7: memref<1x128xf32, #tpu.memory_space<vmem>>, %arg8: memref<128x128xbf16, #tpu.memory_space<vmem>>, %arg9: memref<1x128xf32, #tpu.memory_space<vmem>>, %arg10: memref<128x128xbf16, #tpu.memory_space<vmem>>, %arg11: memref<1x128xf32, #tpu.memory_space<vmem>>, %arg12: memref<256x128xf32, #tpu.memory_space<vmem>>, %arg13: memref<256x128xf32, #tpu.memory_space<vmem>>) attributes {dimension_semantics = [#tpu.dimension_semantics<arbitrary>], iteration_bounds = array<i64: 1>, scalar_prefetch = 0 : i64, scratch_operands = 0 : i64, tpu.core_type = #tpu.core_type<tc>, window_params = [{pipeline_mode = #tpu.pipeline_mode<synchronous>, transform_indices = @transform_0, window_bounds = array<i64: 256, 256>}, {pipeline_mode = #tpu.pipeline_mode<synchronous>, transform_indices = @transform_1, window_bounds = array<i64: 256, 128>}, {pipeline_mode = #tpu.pipeline_mode<synchronous>, transform_indices = @transform_2, window_bounds = array<i64: 256, 128>}, {pipeline_mode = #tpu.pipeline_mode<synchronous>, transform_indices = @transform_3, window_bounds = array<i64: 128, 128>}, {pipeline_mode = #tpu.pipeline_mode<synchronous>, transform_indices = @transform_4, window_bounds = array<i64: 1, 128>}, {pipeline_mode = #tpu.pipeline_mode<synchronous>, transform_indices = @transform_5, window_bounds = array<i64: 128, 128>}, {pipeline_mode = #tpu.pipeline_mode<synchronous>, transform_indices = @transform_6, window_bounds = array<i64: 1, 128>}, {pipeline_mode = #tpu.pipeline_mode<synchronous>, transform_indices = @transform_7, window_bounds = array<i64: 128, 128>}, {pipeline_mode = #tpu.pipeline_mode<synchronous>, transform_indices = @transform_8, window_bounds = array<i64: 1, 128>}, {pipeline_mode = #tpu.pipeline_mode<synchronous>, transform_indices = @transform_9, window_bounds = array<i64: 128, 128>}, {pipeline_mode = #tpu.pipeline_mode<synchronous>, transform_indices = @transform_10, window_bounds = array<i64: 1, 128>}, {pipeline_mode = #tpu.pipeline_mode<synchronous>, transform_indices = @transform_11, window_bounds = array<i64: 256, 128>}, {pipeline_mode = #tpu.pipeline_mode<synchronous>, transform_indices = @transform_12, window_bounds = array<i64: 256, 128>}]} {
    %c0 = arith.constant 0 : index
    %c0_0 = arith.constant 0 : index
    %0 = vector.load %arg1[%c0, %c0_0] : memref<256x256xbf16, #tpu.memory_space<vmem>>, vector<256x256xbf16>
    %c0_1 = arith.constant 0 : index
    %c0_2 = arith.constant 0 : index
    %1 = vector.load %arg2[%c0_1, %c0_2] : memref<256x128xbf16, #tpu.memory_space<vmem>>, vector<256x128xbf16>
    %cst = arith.constant dense<0.000000e+00> : vector<256x128xf32>
    %2 = tpu.matmul %0, %1, %cst {dimension_numbers = #tpu.dot_dimension_numbers<[1], [0], [0], [1], [0, 0, 1, 1], [], []>} : vector<256x256xbf16>, vector<256x128xbf16>, vector<256x128xf32> -> vector<256x128xf32>
    %3 = arith.truncf %2 : vector<256x128xf32> to vector<256x128xbf16>
    %c0_3 = arith.constant 0 : index
    %c0_4 = arith.constant 0 : index
    %4 = vector.load %arg4[%c0_3, %c0_4] : memref<128x128xbf16, #tpu.memory_space<vmem>>, vector<128x128xbf16>
    %cst_5 = arith.constant dense<0.000000e+00> : vector<256x128xf32>
    %5 = tpu.matmul %3, %4, %cst_5 {dimension_numbers = #tpu.dot_dimension_numbers<[1], [0], [0], [1], [0, 0, 1, 1], [], []>} : vector<256x128xbf16>, vector<128x128xbf16>, vector<256x128xf32> -> vector<256x128xf32>
    %c0_6 = arith.constant 0 : index
    %c0_7 = arith.constant 0 : index
    %6 = vector.load %arg5[%c0_6, %c0_7] : memref<1x128xf32, #tpu.memory_space<vmem>>, vector<1x128xf32>
    %7 = vector.broadcast %6 : vector<1x128xf32> to vector<256x128xf32>
    %8 = arith.addf %5, %7 : vector<256x128xf32>
    %cst_8 = arith.constant 0.000000e+00 : f32
    %9 = vector.broadcast %cst_8 : f32 to vector<256x128xf32>
    %10 = arith.maximumf %8, %9 : vector<256x128xf32>
    %c0_9 = arith.constant 0 : index
    %c0_10 = arith.constant 0 : index
    %11 = vector.load %arg1[%c0_9, %c0_10] : memref<256x256xbf16, #tpu.memory_space<vmem>>, vector<256x256xbf16>
    %12 = arith.truncf %10 : vector<256x128xf32> to vector<256x128xbf16>
    %cst_11 = arith.constant dense<0.000000e+00> : vector<256x128xf32>
    %13 = tpu.matmul %11, %12, %cst_11 {dimension_numbers = #tpu.dot_dimension_numbers<[1], [0], [0], [1], [0, 0, 1, 1], [], []>} : vector<256x256xbf16>, vector<256x128xbf16>, vector<256x128xf32> -> vector<256x128xf32>
    %14 = arith.truncf %13 : vector<256x128xf32> to vector<256x128xbf16>
    %c0_12 = arith.constant 0 : index
    %c0_13 = arith.constant 0 : index
    %15 = vector.load %arg6[%c0_12, %c0_13] : memref<128x128xbf16, #tpu.memory_space<vmem>>, vector<128x128xbf16>
    %cst_14 = arith.constant dense<0.000000e+00> : vector<256x128xf32>
    %16 = tpu.matmul %14, %15, %cst_14 {dimension_numbers = #tpu.dot_dimension_numbers<[1], [0], [0], [1], [0, 0, 1, 1], [], []>} : vector<256x128xbf16>, vector<128x128xbf16>, vector<256x128xf32> -> vector<256x128xf32>
    %c0_15 = arith.constant 0 : index
    %c0_16 = arith.constant 0 : index
    %17 = vector.load %arg7[%c0_15, %c0_16] : memref<1x128xf32, #tpu.memory_space<vmem>>, vector<1x128xf32>
    %18 = vector.broadcast %17 : vector<1x128xf32> to vector<256x128xf32>
    %19 = arith.addf %16, %18 : vector<256x128xf32>
    %c0_17 = arith.constant 0 : index
    %c0_18 = arith.constant 0 : index
    %20 = vector.load %arg3[%c0_17, %c0_18] : memref<256x128xf32, #tpu.memory_space<vmem>>, vector<256x128xf32>
    %21 = arith.mulf %19, %20 : vector<256x128xf32>
    %c0_19 = arith.constant 0 : index
    %c0_20 = arith.constant 0 : index
    %22 = vector.load %arg13[%c0_19, %c0_20] : memref<256x128xf32, #tpu.memory_space<vmem>>, vector<256x128xf32>
    tpu.vector_store %arg13[%c0_19, %c0_20], %21 {strides = array<i32>} : memref<256x128xf32, #tpu.memory_space<vmem>>, vector<256x128xf32>,
    %c0_21 = arith.constant 0 : index
    %c0_22 = arith.constant 0 : index
    %23 = vector.load %arg8[%c0_21, %c0_22] : memref<128x128xbf16, #tpu.memory_space<vmem>>, vector<128x128xbf16>
    %24 = arith.extf %23 : vector<128x128xbf16> to vector<128x128xf32>
    %cst_23 = arith.constant dense<0.000000e+00> : vector<256x128xf32>
    %25 = tpu.matmul %21, %24, %cst_23 {dimension_numbers = #tpu.dot_dimension_numbers<[1], [0], [0], [1], [0, 0, 1, 1], [], []>} : vector<256x128xf32>, vector<128x128xf32>, vector<256x128xf32> -> vector<256x128xf32>
    %c0_24 = arith.constant 0 : index
    %c0_25 = arith.constant 0 : index
    %26 = vector.load %arg9[%c0_24, %c0_25] : memref<1x128xf32, #tpu.memory_space<vmem>>, vector<1x128xf32>
    %27 = vector.broadcast %26 : vector<1x128xf32> to vector<256x128xf32>
    %28 = arith.addf %25, %27 : vector<256x128xf32>
    %cst_26 = arith.constant 0.000000e+00 : f32
    %29 = vector.broadcast %cst_26 : f32 to vector<256x128xf32>
    %30 = arith.maximumf %28, %29 : vector<256x128xf32>
    %c0_27 = arith.constant 0 : index
    %c0_28 = arith.constant 0 : index
    %31 = vector.load %arg10[%c0_27, %c0_28] : memref<128x128xbf16, #tpu.memory_space<vmem>>, vector<128x128xbf16>
    %32 = arith.extf %31 : vector<128x128xbf16> to vector<128x128xf32>
    %cst_29 = arith.constant dense<0.000000e+00> : vector<256x128xf32>
    %33 = tpu.matmul %30, %32, %cst_29 {dimension_numbers = #tpu.dot_dimension_numbers<[1], [0], [0], [1], [0, 0, 1, 1], [], []>} : vector<256x128xf32>, vector<128x128xf32>, vector<256x128xf32> -> vector<256x128xf32>
    %c0_30 = arith.constant 0 : index
    %c0_31 = arith.constant 0 : index
    %34 = vector.load %arg11[%c0_30, %c0_31] : memref<1x128xf32, #tpu.memory_space<vmem>>, vector<1x128xf32>
    %35 = vector.broadcast %34 : vector<1x128xf32> to vector<256x128xf32>
    %36 = arith.addf %33, %35 : vector<256x128xf32>
    %c0_32 = arith.constant 0 : index
    %c0_33 = arith.constant 0 : index
    %37 = vector.load %arg12[%c0_32, %c0_33] : memref<256x128xf32, #tpu.memory_space<vmem>>, vector<256x128xf32>
    tpu.vector_store %arg12[%c0_32, %c0_33], %36 {strides = array<i32>} : memref<256x128xf32, #tpu.memory_space<vmem>>, vector<256x128xf32>,
    return
  }
  func.func @transform_0(%arg0: i32) -> (i32, i32) {
    %c0_i32 = arith.constant 0 : i32
    %c0_i32_0 = arith.constant 0 : i32
    %c0_i32_1 = arith.constant 0 : i32
    return %c0_i32, %c0_i32_0 : i32, i32
  }
  func.func @transform_1(%arg0: i32) -> (i32, i32) {
    %c0_i32 = arith.constant 0 : i32
    %c0_i32_0 = arith.constant 0 : i32
    %c0_i32_1 = arith.constant 0 : i32
    return %c0_i32, %c0_i32_0 : i32, i32
  }
  func.func @transform_2(%arg0: i32) -> (i32, i32) {
    %c0_i32 = arith.constant 0 : i32
    %c0_i32_0 = arith.constant 0 : i32
    %c0_i32_1 = arith.constant 0 : i32
    return %c0_i32, %c0_i32_0 : i32, i32
  }
  func.func @transform_3(%arg0: i32) -> (i32, i32) {
    %c0_i32 = arith.constant 0 : i32
    %c0_i32_0 = arith.constant 0 : i32
    %c0_i32_1 = arith.constant 0 : i32
    return %c0_i32, %c0_i32_0 : i32, i32
  }
  func.func @transform_4(%arg0: i32) -> (i32, i32) {
    %c0_i32 = arith.constant 0 : i32
    %c0_i32_0 = arith.constant 0 : i32
    %c0_i32_1 = arith.constant 0 : i32
    return %c0_i32, %c0_i32_0 : i32, i32
  }
  func.func @transform_5(%arg0: i32) -> (i32, i32) {
    %c0_i32 = arith.constant 0 : i32
    %c0_i32_0 = arith.constant 0 : i32
    %c0_i32_1 = arith.constant 0 : i32
    return %c0_i32, %c0_i32_0 : i32, i32
  }
  func.func @transform_6(%arg0: i32) -> (i32, i32) {
    %c0_i32 = arith.constant 0 : i32
    %c0_i32_0 = arith.constant 0 : i32
    %c0_i32_1 = arith.constant 0 : i32
    return %c0_i32, %c0_i32_0 : i32, i32
  }
  func.func @transform_7(%arg0: i32) -> (i32, i32) {
    %c0_i32 = arith.constant 0 : i32
    %c0_i32_0 = arith.constant 0 : i32
    %c0_i32_1 = arith.constant 0 : i32
    return %c0_i32, %c0_i32_0 : i32, i32
  }
  func.func @transform_8(%arg0: i32) -> (i32, i32) {
    %c0_i32 = arith.constant 0 : i32
    %c0_i32_0 = arith.constant 0 : i32
    %c0_i32_1 = arith.constant 0 : i32
    return %c0_i32, %c0_i32_0 : i32, i32
  }
  func.func @transform_9(%arg0: i32) -> (i32, i32) {
    %c0_i32 = arith.constant 0 : i32
    %c0_i32_0 = arith.constant 0 : i32
    %c0_i32_1 = arith.constant 0 : i32
    return %c0_i32, %c0_i32_0 : i32, i32
  }
  func.func @transform_10(%arg0: i32) -> (i32, i32) {
    %c0_i32 = arith.constant 0 : i32
    %c0_i32_0 = arith.constant 0 : i32
    %c0_i32_1 = arith.constant 0 : i32
    return %c0_i32, %c0_i32_0 : i32, i32
  }
  func.func @transform_11(%arg0: i32) -> (i32, i32) {
    %c0_i32 = arith.constant 0 : i32
    %c0_i32_0 = arith.constant 0 : i32
    %c0_i32_1 = arith.constant 0 : i32
    return %c0_i32, %c0_i32_0 : i32, i32
  }
  func.func @transform_12(%arg0: i32) -> (i32, i32) {
    %c0_i32 = arith.constant 0 : i32
    %c0_i32_0 = arith.constant 0 : i32
    %c0_i32_1 = arith.constant 0 : i32
    return %c0_i32, %c0_i32_0 : i32, i32
  }
}

</mosaic_0001>

<bundles_post_ra>
// kernel: tpu_custom_call.1
= control target key start
LH: loop header
LB: loop body
LE: loop exit
PB: predicated region body
PF: predicated region fallthrough
CT: control target
= control target key end

     0   :  { %18 = vsyncpa [#allocation3], 0  ;;  %s3696_s0 = inlined_call_operand.hbm [shape: bf16[256,256], index: 0, kind: input, shape index: {}]   ;;  %s3697_s1 = inlined_call_operand.hbm [shape: bf16[256,128], index: 1, kind: input, shape index: {}]   ;;  %s3698_s2 = inlined_call_operand.hbm [shape: f32[256,128], index: 2, kind: input, shape index: {}]   ;;  %s3699_s3 = inlined_call_operand.hbm [shape: bf16[128,128], index: 3, kind: input, shape index: {}]   ;;  %s3700_s4 = inlined_call_operand.vmem [shape: f32[1,128], index: 4, kind: input, shape index: {}]   ;;  %s3701_s5 = inlined_call_operand.hbm [shape: bf16[128,128], index: 5, kind: input, shape index: {}]   ;;  %s3702_s6 = inlined_call_operand.vmem [shape: f32[1,128], index: 6, kind: input, shape index: {}]   ;;  %s3703_s7 = inlined_call_operand.hbm [shape: bf16[128,128], index: 7, kind: input, shape index: {}]   ;;  %s3704_s8 = inlined_call_operand.vmem [shape: f32[1,128], index: 8, kind: input, shape index: {}]   ;;  %s3705_s9 = inlined_call_operand.hbm [shape: bf16[128,128], index: 9, kind: input, shape index: {}]   ;;  %s3706_s10 = inlined_call_operand.vmem [shape: f32[1,128], index: 10, kind: input, shape index: {}]   ;;  %s3707_s11 = inlined_call_operand.hbm [shape: f32[256,128], index: 11, kind: output, shape index: {0}]   ;;  %s3708_s12 = inlined_call_operand.hbm [shape: f32[256,128], index: 12, kind: output, shape index: {1}]  }
   0x1   :  { %19 = vsyncpa [#allocation6], 0 }
   0x2   :  { %20 = vsyncpa [#allocation9], 0 }
   0x3   :  { %21 = vsyncpa [#allocation12], 0 }
   0x4   :  { %22 = vsyncpa [#allocation4], 0 }
   0x5   :  { %23 = vsyncpa [#allocation16], 0  ;;  %s3185_s21 = smov [#allocation5]   ;;  %s2975_s25 = scalar_lea.hbm %s3697_s1, 2048 }
   0x6   :  { %s41_s22 = sshll.u32 %s3185_s21, 4  ;;  %p2976_p0 = scmp.ne.s32.totalorder %s3697_s1, %s2975_s25  ;;  %s42_s22 = int_to_ptr.vmem [resolvable:$true] %s41_s22 }
   0x7   :  { %p2979_p1 = scmp.lt.u32.totalorder %s2975_s25, %s3697_s1 }
   0x9   :  { %p2981_p2 = pnand %p2979_p1, %p2976_p0 }
   0xb   :  { %2984 = shalt.err (!%p2981_p2)
}
   0xc   :  { %s2985_s30 = scalar_lea.vmem %s42_s22, 2048  ;;  %p2990_p4 = scmp.lt.s32.totalorder %s42_s22, %s42_s22 }
   0xd   :  { %p2986_p3 = scmp.ne.s32.totalorder %s42_s22, %s2985_s30  ;;  %p2991_p5 = scmp.lt.s32.totalorder %s2985_s30, %s2985_s30 }
   0xf   :  { %p2992_p6 = por %p2991_p5, %p2990_p4 }
  0x11   :  { %p2993_p7 = pnand %p2992_p6, %p2986_p3 }
  0x13   :  { %2996 = shalt.err (!%p2993_p7)
}
  0x14   :  { %s3186_s13 = smov 64   ;;  %s3187_s14 = smov 4  }
  0x15   :  { %47 = dma.hbm_to_vmem [thread:$0]  %s3697_s1, 2048, %s42_s22, [#allocation6], %s3186_s13, %s3186_s13, %s3187_s14  }
  0x16   :  { %s3188_s17 = smov [#allocation8]   ;;  %s3189_s19 = smov [#allocation11]  }
  0x17   :  { %s65_s18 = sshll.u32 %s3188_s17, 4  ;;  %s93_s20 = sshll.u32 %s3189_s19, 4  ;;  %s66_s18 = int_to_ptr.vmem [resolvable:$true] %s65_s18  ;;  %s94_s20 = int_to_ptr.vmem [resolvable:$true] %s93_s20 }
  0x18   :  { %s2997_s24 = scalar_lea.hbm %s3699_s3, 1024 }
  0x19   :  { %p2998_p8 = scmp.ne.s32.totalorder %s3699_s3, %s2997_s24  ;;  %p3001_p9 = scmp.lt.u32.totalorder %s2997_s24, %s3699_s3 }
  0x1b   :  { %p3003_p10 = pnand %p3001_p9, %p2998_p8 }
  0x1d   :  { %3006 = shalt.err (!%p3003_p10)
}
  0x1e   :  { %s3007_s1 = scalar_lea.vmem %s66_s18, 1024  ;;  %p3012_p12 = scmp.lt.s32.totalorder %s66_s18, %s66_s18 }
  0x1f   :  { %p3008_p11 = scmp.ne.s32.totalorder %s66_s18, %s3007_s1  ;;  %p3013_p13 = scmp.lt.s32.totalorder %s3007_s1, %s3007_s1 }
  0x21   :  { %p3014_p0 = por %p3013_p13, %p3012_p12 }
  0x23   :  { %p3015_p1 = pnand %p3014_p0, %p3008_p11 }
  0x25   :  { %3018 = shalt.err (!%p3015_p1)
}
  0x26   :  { %71 = dma.hbm_to_vmem [thread:$0]  %s3699_s3, 1024, %s66_s18, [#allocation9], %s3186_s13, %s3186_s13, %s3187_s14  }
  0x27   :  { %s3019_s16 = scalar_lea.hbm %s3703_s7, 1024 }
  0x28   :  { %p3020_p2 = scmp.ne.s32.totalorder %s3703_s7, %s3019_s16  ;;  %p3023_p3 = scmp.lt.u32.totalorder %s3019_s16, %s3703_s7 }
  0x2a   :  { %p3025_p4 = pnand %p3023_p3, %p3020_p2 }
  0x2c   :  { %3028 = shalt.err (!%p3025_p4)
}
  0x2d   :  { %s3029_s24 = scalar_lea.vmem %s94_s20, 1024  ;;  %p3034_p6 = scmp.lt.s32.totalorder %s94_s20, %s94_s20 }
  0x2e   :  { %p3030_p5 = scmp.ne.s32.totalorder %s94_s20, %s3029_s24  ;;  %p3035_p7 = scmp.lt.s32.totalorder %s3029_s24, %s3029_s24 }
  0x30   :  { %p3036_p8 = por %p3035_p7, %p3034_p6 }
  0x32   :  { %p3037_p9 = pnand %p3036_p8, %p3030_p5 }
  0x34   :  { %3040 = shalt.err (!%p3037_p9)
}
  0x35   :  { %99 = dma.hbm_to_vmem [thread:$0]  %s3703_s7, 1024, %s94_s20, [#allocation12], %s3186_s13, %s3186_s13, %s3187_s14  }
  0x36   :  { %s3190_s25 = smov [#allocation2]   ;;  %s3041_s1 = scalar_lea.hbm %s3696_s0, 4096 }
  0x37   :  { %s29_s26 = sshll.u32 %s3190_s25, 4  ;;  %p3042_p10 = scmp.ne.s32.totalorder %s3696_s0, %s3041_s1  ;;  %s30_s26 = int_to_ptr.vmem [resolvable:$true] %s29_s26 }
  0x38   :  { %p3045_p11 = scmp.lt.u32.totalorder %s3041_s1, %s3696_s0 }
  0x3a   :  { %p3047_p12 = pnand %p3045_p11, %p3042_p10 }
  0x3c   :  { %3050 = shalt.err (!%p3047_p12)
}
  0x3d   :  { %s3051_s16 = scalar_lea.vmem %s30_s26, 4096  ;;  %p3056_p0 = scmp.lt.s32.totalorder %s30_s26, %s30_s26 }
  0x3e   :  { %p3052_p13 = scmp.ne.s32.totalorder %s30_s26, %s3051_s16  ;;  %p3057_p1 = scmp.lt.s32.totalorder %s3051_s16, %s3051_s16 }
  0x40   :  { %p3058_p2 = por %p3057_p1, %p3056_p0 }
  0x42   :  { %p3059_p3 = pnand %p3058_p2, %p3052_p13 }
  0x44   :  { %3062 = shalt.err (!%p3059_p3)
}
  0x45   :  { %s3191_s7 = smov 128   ;;  %s3192_s20 = smov 8  }
  0x46   :  { %35 = dma.hbm_to_vmem [thread:$0]  %s3696_s0, 4096, %s30_s26, [#allocation3], %s3191_s7, %s3191_s7, %s3192_s20  }
  0x47   :  { %s3193_s21 = smov [#allocation7]   ;;  %s3194_s24 = smov [#allocation10]  }
  0x48   :  { %s53_s23 = sshll.u32 %s3193_s21, 4  ;;  %s79_s3 = sshll.u32 %s3194_s24, 4  ;;  %s54_s23 = int_to_ptr.vmem [resolvable:$true] %s53_s23  ;;  %s3323_s3 = int_to_ptr.vmem [resolvable:$true] %s79_s3 }
  0x49   :  { %s3063_s27 = scalar_lea.hbm %s3698_s2, 4096 }
  0x4a   :  { %p3064_p4 = scmp.ne.s32.totalorder %s3698_s2, %s3063_s27  ;;  %p3067_p5 = scmp.lt.u32.totalorder %s3063_s27, %s3698_s2 }
  0x4c   :  { %p3069_p6 = pnand %p3067_p5, %p3064_p4 }
  0x4e   :  { %3072 = shalt.err (!%p3069_p6)
}
  0x4f   :  { %s3073_s0 = scalar_lea.vmem %s54_s23, 4096  ;;  %p3078_p8 = scmp.lt.s32.totalorder %s54_s23, %s54_s23 }
  0x50   :  { %p3074_p7 = scmp.ne.s32.totalorder %s54_s23, %s3073_s0  ;;  %p3079_p9 = scmp.lt.s32.totalorder %s3073_s0, %s3073_s0 }
  0x52   :  { %p3080_p10 = por %p3079_p9, %p3078_p8 }
  0x54   :  { %p3081_p11 = pnand %p3080_p10, %p3074_p7 }
  0x56   :  { %3084 = shalt.err (!%p3081_p11)
}
  0x57   :  { %59 = dma.hbm_to_vmem [thread:$0]  %s3698_s2, 4096, %s54_s23, [#allocation6], %s3191_s7, %s3191_s7, %s3192_s20  }
  0x58   :  { %s3085_s17 = scalar_lea.hbm %s3701_s5, 1024 }
  0x59   :  { %p3086_p12 = scmp.ne.s32.totalorder %s3701_s5, %s3085_s17  ;;  %p3089_p13 = scmp.lt.u32.totalorder %s3085_s17, %s3701_s5 }
  0x5b   :  { %p3091_p0 = pnand %p3089_p13, %p3086_p12 }
  0x5d   :  { %3094 = shalt.err (!%p3091_p0)
}
  0x5e   :  { %s3095_s25 = scalar_lea.vmem %s3323_s3, 1024  ;;  %p3100_p2 = scmp.lt.s32.totalorder %s3323_s3, %s3323_s3 }
  0x5f   :  { %p3096_p1 = scmp.ne.s32.totalorder %s3323_s3, %s3095_s25  ;;  %p3101_p3 = scmp.lt.s32.totalorder %s3095_s25, %s3095_s25 }
  0x61   :  { %p3102_p4 = por %p3101_p3, %p3100_p2 }
  0x63   :  { %p3103_p5 = pnand %p3102_p4, %p3096_p1 }
  0x65   :  { %3106 = shalt.err (!%p3103_p5)
}
  0x66   :  { %85 = dma.hbm_to_vmem [thread:$0]  %s3701_s5, 1024, %s3323_s3, [#allocation9], %s3186_s13, %s3186_s13, %s3187_s14  }
  0x67   :  { %s3195_s27 = smov [#allocation13]   ;;  %s3107_s29 = scalar_lea.hbm %s3705_s9, 1024 }
  0x68   :  { %s107_s28 = sshll.u32 %s3195_s27, 4  ;;  %p3108_p6 = scmp.ne.s32.totalorder %s3705_s9, %s3107_s29  ;;  %s108_s28 = int_to_ptr.vmem [resolvable:$true] %s107_s28 }
  0x69   :  { %p3111_p7 = scmp.lt.u32.totalorder %s3107_s29, %s3705_s9 }
  0x6b   :  { %p3113_p8 = pnand %p3111_p7, %p3108_p6 }
  0x6d   :  { %3116 = shalt.err (!%p3113_p8)
}
  0x6e   :  { %s3117_s16 = scalar_lea.vmem %s108_s28, 1024  ;;  %p3122_p10 = scmp.lt.s32.totalorder %s108_s28, %s108_s28 }
  0x6f   :  { %p3118_p9 = scmp.ne.s32.totalorder %s108_s28, %s3117_s16  ;;  %p3123_p11 = scmp.lt.s32.totalorder %s3117_s16, %s3117_s16 }
  0x71   :  { %p3124_p12 = por %p3123_p11, %p3122_p10 }
  0x73   :  { %p3125_p13 = pnand %p3124_p12, %p3118_p9 }
  0x75   :  { %3128 = shalt.err (!%p3125_p13)
}
  0x76   :  { %113 = dma.hbm_to_vmem [thread:$0]  %s3705_s9, 1024, %s108_s28, [#allocation12], %s3186_s13, %s3186_s13, %s3187_s14  }
  0x77   :  { %3173 = dma.done.wait [#allocation3], 4096  }
  0x78   :  { %3174 = vsyncadd [#allocation3], 4294963200 }
  0x79   :  { %3175 = dma.done.wait [#allocation6], 6144  }
  0x7a   :  { %3176 = vsyncadd [#allocation6], 4294961152 }
  0x7b   :  { %3177 = dma.done.wait [#allocation9], 2048  }
  0x7c   :  { %3178 = vsyncadd [#allocation9], 4294965248 }
  0x7d   :  { %3179 = dma.done.wait [#allocation12], 2048  }
  0x7e   :  { %3180 = vsyncadd [#allocation12], 4294965248  ;;  %v2895_v0 = vld [vmem:[#allocation5 + $0x40] sm:$0xff]   ;;  %v2897_v2 = vld [vmem:[#allocation5 + $0x48] sm:$0xff]  }
  0x7f   :  { %v2896_v1 = vld [vmem:[#allocation5] sm:$0xff]   ;;  %2194 = vmatprep.subr.bf16.mxu0 %v2895_v0  ;;  %v2898_v3 = vld [vmem:[#allocation5 + $0x8] sm:$0xff]   ;;  %v2899_v4 = vld [vmem:[#allocation5 + $0x50] sm:$0xff]  }
  0x80   :  { %2195 = vmatpush3.bf16.msra.mxu0 %v2896_v1  ;;  %v2900_v5 = vld [vmem:[#allocation5 + $0x10] sm:$0xff]   ;;  %v2901_v6 = vld [vmem:[#allocation5 + $0x58] sm:$0xff]   ;;  %v2903_v8 = vld [vmem:[#allocation5 + $0x60] sm:$0xff]  }
  0x81   :  { %2196 = vmatprep.subr.bf16.mxu0 %v2897_v2  ;;  %v2902_v7 = vld [vmem:[#allocation5 + $0x18] sm:$0xff]   ;;  %v2904_v9 = vld [vmem:[#allocation5 + $0x20] sm:$0xff]   ;;  %v2905_v10 = vld [vmem:[#allocation5 + $0x68] sm:$0xff]  }
  0x82   :  { %v3375_v11 = vld [vmem:[#allocation2 + $0x4] ss:$8 sps:$4 sm:$0xff]   ;;  %v2907_v13 = vld [vmem:[#allocation5 + $0x70] sm:$0xff]   ;;  %v2909_v15 = vld [vmem:[#allocation5 + $0x78] sm:$0xff]  }
  0x83   :  { %v2906_v12 = vld [vmem:[#allocation5 + $0x28] sm:$0xff]   ;;  %490 = vmatprep.mubr.bf16.mxu0 %v3375_v11  ;;  %v2908_v14 = vld [vmem:[#allocation5 + $0x30] sm:$0xff]   ;;  %v2910_v16 = vld [vmem:[#allocation5 + $0x38] sm:$0xff]  }
  0x84   :  { %2197 = vmatpush3.bf16.msra.mxu0 %v2898_v3  ;;  %v3378_v17 = vld [vmem:[#allocation2] ss:$8 sps:$4 sm:$0xff]   ;;  %v3380_v18 = vld [vmem:[#allocation2 + $0x14] ss:$8 sps:$4 sm:$0xff]   ;;  %v3384_v19 = vld [vmem:[#allocation2 + $0x10] ss:$8 sps:$4 sm:$0xff]  }
  0x85   :  { %2198 = vmatprep.subr.bf16.mxu0 %v2899_v4  ;;  %v3386_v20 = vld [vmem:[#allocation2 + $0x24] ss:$8 sps:$4 sm:$0xff]   ;;  %v2961_v23 = vld [vmem:[#allocation8 + $0x10] sm:$0xff]   ;;  %v3390_v24 = vld [vmem:[#allocation2 + $0x20] ss:$8 sps:$4 sm:$0xff]  }
  0x86   :  { %v2959_v21 = vld [vmem:[#allocation8] sm:$0xff]   ;;  %v2960_v22 = vld [vmem:[#allocation8 + $0x8] sm:$0xff]   ;;  %v2962_v25 = vld [vmem:[#allocation8 + $0x18] sm:$0xff]  }
  0x87   :  { %2562 = vmatprep.subr.bf16.mxu1 %v2959_v21  ;;  %v3392_v26 = vld [vmem:[#allocation2 + $0x34] ss:$8 sps:$4 sm:$0xff]   ;;  %v3396_v27 = vld [vmem:[#allocation2 + $0x30] ss:$8 sps:$4 sm:$0xff]   ;;  %v3398_v28 = vld [vmem:[#allocation2 + $0x44] ss:$8 sps:$4 sm:$0xff]  }
  0x88   :  { %2199 = vmatpush3.bf16.msra.mxu0 %v2900_v5  ;;  %2563 = vmatpush3.bf16.msra.mxu1 %v2959_v21  ;;  %v3402_v29 = vld [vmem:[#allocation2 + $0x40] ss:$8 sps:$4 sm:$0xff]   ;;  %v3404_v30 = vld [vmem:[#allocation2 + $0x54] ss:$8 sps:$4 sm:$0xff]   ;;  %v3408_v31 = vld [vmem:[#allocation2 + $0x50] ss:$8 sps:$4 sm:$0xff]  }
  0x89   :  { %2200 = vmatprep.subr.bf16.mxu0 %v2901_v6  ;;  %2564 = vmatprep.subr.bf16.mxu1 %v2960_v22  ;;  %v3410_v32 = vld [vmem:[#allocation2 + $0x64] ss:$8 sps:$4 sm:$0xff]   ;;  %v3414_v33 = vld [vmem:[#allocation2 + $0x60] ss:$8 sps:$4 sm:$0xff]   ;;  %v3416_v34 = vld [vmem:[#allocation2 + $0x74] ss:$8 sps:$4 sm:$0xff]  }
  0x8a   :  { %v3420_v35 = vld [vmem:[#allocation2 + $0x70] ss:$8 sps:$4 sm:$0xff]   ;;  %v3422_v36 = vld [vmem:[#allocation2 + $0x84] ss:$8 sps:$4 sm:$0xff]   ;;  %v3426_v37 = vld [vmem:[#allocation2 + $0x80] ss:$8 sps:$4 sm:$0xff]  }
  0x8b   :  { %v3428_v38 = vld [vmem:[#allocation2 + $0x94] ss:$8 sps:$4 sm:$0xff]   ;;  %v3432_v39 = vld [vmem:[#allocation2 + $0x90] ss:$8 sps:$4 sm:$0xff]   ;;  %v3434_v40 = vld [vmem:[#allocation2 + $0xa4] ss:$8 sps:$4 sm:$0xff]  }
  0x8c   :  { %2201 = vmatpush3.bf16.msra.mxu0 %v2902_v7  ;;  %2565 = vmatpush3.bf16.msra.mxu1 %v2960_v22  ;;  %v3438_v41 = vld [vmem:[#allocation2 + $0xa0] ss:$8 sps:$4 sm:$0xff]   ;;  %v3440_v42 = vld [vmem:[#allocation2 + $0xb4] ss:$8 sps:$4 sm:$0xff]   ;;  %v3444_v44 = vld [vmem:[#allocation2 + $0xb0] ss:$8 sps:$4 sm:$0xff]  }
  0x8d   :  { %2202 = vmatprep.subr.bf16.mxu0 %v2903_v8  ;;  %2566 = vmatprep.subr.bf16.mxu1 %v2961_v23  ;;  %v2963_v43 = vld [vmem:[#allocation8 + $0x20] sm:$0xff]   ;;  %v2964_v46 = vld [vmem:[#allocation8 + $0x28] sm:$0xff]   ;;  %v2965_v47 = vld [vmem:[#allocation8 + $0x30] sm:$0xff]  }
  0x8e   :  { %v3446_v45 = vld [vmem:[#allocation2 + $0xc4] ss:$8 sps:$4 sm:$0xff]   ;;  %v3450_v48 = vld [vmem:[#allocation2 + $0xc0] ss:$8 sps:$4 sm:$0xff]   ;;  %v3452_v49 = vld [vmem:[#allocation2 + $0xd4] ss:$8 sps:$4 sm:$0xff]  }
  0x8f   :  { %v2966_v50 = vld [vmem:[#allocation8 + $0x38] sm:$0xff]   ;;  %v3458_v52 = vld [vmem:[#allocation2 + $0xe4] ss:$8 sps:$4 sm:$0xff]   ;;  %v3462_v53 = vld [vmem:[#allocation2 + $0xe0] ss:$8 sps:$4 sm:$0xff]  }
  0x90   :  { %2203 = vmatpush3.bf16.msra.mxu0 %v2904_v9  ;;  %2567 = vmatpush3.bf16.msra.mxu1 %v2961_v23  ;;  %v3456_v51 = vld [vmem:[#allocation2 + $0xd0] ss:$8 sps:$4 sm:$0xff]   ;;  %v3464_v54 = vld [vmem:[#allocation2 + $0xf4] ss:$8 sps:$4 sm:$0xff]  }
  0x91   :  { %2204 = vmatprep.subr.bf16.mxu0 %v2905_v10  ;;  %2568 = vmatprep.subr.bf16.mxu1 %v2962_v25  ;;  %v3468_v55 = vld [vmem:[#allocation2 + $0xf0] ss:$8 sps:$4 sm:$0xff]  }
  0x94   :  { %2205 = vmatpush3.bf16.msra.mxu0 %v2906_v12  ;;  %2569 = vmatpush3.bf16.msra.mxu1 %v2962_v25 }
  0x95   :  { %2206 = vmatprep.subr.bf16.mxu0 %v2907_v13  ;;  %2570 = vmatprep.subr.bf16.mxu1 %v2963_v43 }
  0x98   :  { %2207 = vmatpush3.bf16.msra.mxu0 %v2908_v14  ;;  %2571 = vmatpush3.bf16.msra.mxu1 %v2963_v43 }
  0x99   :  { %2208 = vmatprep.subr.bf16.mxu0 %v2909_v15  ;;  %2572 = vmatprep.subr.bf16.mxu1 %v2964_v46 }
  0x9c   :  { %2209 = vmatpush3.bf16.msra.mxu0 %v2910_v16  ;;  %2573 = vmatpush3.bf16.msra.mxu1 %v2964_v46 }
  0x9d   :  { %2574 = vmatprep.subr.bf16.mxu1 %v2965_v47 }
  0x9f   :  { %491 = vmatmul.mubr.bf16.vlgmr.msra.gmra.mrb[0].mxu0 %v3378_v17 }
  0xa0   :  { %498 = vmatprep.mubr.bf16.mxu0 %v3380_v18  ;;  %2575 = vmatpush3.bf16.msra.mxu1 %v2965_v47 }
  0xa1   :  { %2576 = vmatprep.subr.bf16.mxu1 %v2966_v50 }
  0xa4   :  { %2577 = vmatpush3.bf16.msra.mxu1 %v2966_v50 }
  0xa7   :  { %499 = vmatmul.mubr.bf16.gmra.mrb[4].mxu0 %v3384_v19 }
  0xa8   :  { %506 = vmatprep.mubr.bf16.mxu0 %v3386_v20 }
  0xaf   :  { %507 = vmatmul.mubr.bf16.gmra.mrb[8].mxu0 %v3390_v24 }
  0xb0   :  { %514 = vmatprep.mubr.bf16.mxu0 %v3392_v26 }
  0xb7   :  { %515 = vmatmul.mubr.bf16.gmra.mrb[12].mxu0 %v3396_v27 }
  0xb8   :  { %522 = vmatprep.mubr.bf16.mxu0 %v3398_v28 }
  0xbf   :  { %523 = vmatmul.mubr.bf16.gmra.mrb[16].mxu0 %v3402_v29 }
  0xc0   :  { %530 = vmatprep.mubr.bf16.mxu0 %v3404_v30 }
  0xc7   :  { %531 = vmatmul.mubr.bf16.gmra.mrb[20].mxu0 %v3408_v31 }
  0xc8   :  { %538 = vmatprep.mubr.bf16.mxu0 %v3410_v32 }
  0xcf   :  { %539 = vmatmul.mubr.bf16.gmra.mrb[24].mxu0 %v3414_v33 }
  0xd0   :  { %546 = vmatprep.mubr.bf16.mxu0 %v3416_v34 }
  0xd7   :  { %547 = vmatmul.mubr.bf16.gmra.mrb[28].mxu0 %v3420_v35 }
  0xd8   :  { %554 = vmatprep.mubr.bf16.mxu0 %v3422_v36 }
  0xdf   :  { %555 = vmatmul.mubr.bf16.gmra.mrb[32].mxu0 %v3426_v37 }
  0xe0   :  { %562 = vmatprep.mubr.bf16.mxu0 %v3428_v38 }
  0xe7   :  { %563 = vmatmul.mubr.bf16.gmra.mrb[36].mxu0 %v3432_v39 }
  0xe8   :  { %570 = vmatprep.mubr.bf16.mxu0 %v3434_v40 }
  0xef   :  { %571 = vmatmul.mubr.bf16.gmra.mrb[40].mxu0 %v3438_v41 }
  0xf0   :  { %578 = vmatprep.mubr.bf16.mxu0 %v3440_v42 }
  0xf7   :  { %579 = vmatmul.mubr.bf16.gmra.mrb[44].mxu0 %v3444_v44 }
  0xf8   :  { %586 = vmatprep.mubr.bf16.mxu0 %v3446_v45 }
  0xff   :  { %587 = vmatmul.mubr.bf16.gmra.mrb[48].mxu0 %v3450_v48 }
 0x100   :  { %594 = vmatprep.mubr.bf16.mxu0 %v3452_v49 }
 0x107   :  { %595 = vmatmul.mubr.bf16.gmra.mrb[52].mxu0 %v3456_v51 }
 0x108   :  { %602 = vmatprep.mubr.bf16.mxu0 %v3458_v52 }
 0x10f   :  { %603 = vmatmul.mubr.bf16.gmra.mrb[56].mxu0 %v3462_v53 }
 0x110   :  { %610 = vmatprep.mubr.bf16.mxu0 %v3464_v54 }
 0x117   :  { %611 = vmatmul.mubr.bf16.gmra.mrb[60].mxu0 %v3468_v55 }
 0x172   :  { %v2210_v56 = vpop.f32.mrb[0].mxu0 }
 0x173   :  { %v2211_v57 = vpop.f32.mrb[1].mxu0 }
 0x174   :  { %v2212_v58 = vadd.f32 %v2211_v57, %v2210_v56  ;;  %v2213_v59 = vpop.f32.mrb[2].mxu0 }
 0x175   :  { %v2214_v60 = vpop.f32.mrb[3].mxu0 }
 0x176   :  { %v2215_v61 = vadd.f32 %v2214_v60, %v2213_v59 }
 0x178   :  { %v619_v62 = vpack.c.bf16 %v2215_v61, %v2212_v58 }
 0x17a   :  { %v2216_v63 = vpop.f32.mrb[4].mxu0  ;;  %2578 = vmatprep.mubr.bf16.mxu1 %v619_v62 }
 0x17b   :  { %v2217_v0 = vpop.f32.mrb[5].mxu0 }
 0x17c   :  { %v2218_v1 = vadd.f32 %v2217_v0, %v2216_v63  ;;  %v2219_v2 = vpop.f32.mrb[6].mxu0 }
 0x17d   :  { %v2220_v3 = vpop.f32.mrb[7].mxu0 }
 0x17e   :  { %v2221_v4 = vadd.f32 %v2220_v3, %v2219_v2 }
 0x180   :  { %v620_v5 = vpack.c.bf16 %v2221_v4, %v2218_v1 }
 0x182   :  { %v2222_v6 = vpop.f32.mrb[8].mxu0  ;;  %2579 = vmatmul.mubr.bf16.vlgmr.msra.gmra.mrb[0].mxu1 %v620_v5 }
 0x183   :  { %v2223_v7 = vpop.f32.mrb[9].mxu0 }
 0x184   :  { %v2224_v8 = vadd.f32 %v2223_v7, %v2222_v6  ;;  %v2225_v9 = vpop.f32.mrb[10].mxu0 }
 0x185   :  { %v2226_v10 = vpop.f32.mrb[11].mxu0 }
 0x186   :  { %v2227_v12 = vadd.f32 %v2226_v10, %v2225_v9 }
 0x188   :  { %v621_v13 = vpack.c.bf16 %v2227_v12, %v2224_v8 }
 0x18a   :  { %v2228_v14 = vpop.f32.mrb[12].mxu0  ;;  %2582 = vmatprep.mubr.bf16.mxu1 %v621_v13 }
 0x18b   :  { %v2229_v15 = vpop.f32.mrb[13].mxu0 }
 0x18c   :  { %v2230_v16 = vadd.f32 %v2229_v15, %v2228_v14  ;;  %v2231_v21 = vpop.f32.mrb[14].mxu0 }
 0x18d   :  { %v2232_v22 = vpop.f32.mrb[15].mxu0 }
 0x18e   :  { %v2233_v23 = vadd.f32 %v2232_v22, %v2231_v21 }
 0x190   :  { %v622_v25 = vpack.c.bf16 %v2233_v23, %v2230_v16 }
 0x192   :  { %v2234_v43 = vpop.f32.mrb[16].mxu0  ;;  %2583 = vmatmul.mubr.bf16.gmra.mrb[4].mxu1 %v622_v25 }
 0x193   :  { %v2235_v46 = vpop.f32.mrb[17].mxu0 }
 0x194   :  { %v2236_v47 = vadd.f32 %v2235_v46, %v2234_v43  ;;  %v2237_v50 = vpop.f32.mrb[18].mxu0 }
 0x195   :  { %v2238_v56 = vpop.f32.mrb[19].mxu0 }
 0x196   :  { %v2239_v57 = vadd.f32 %v2238_v56, %v2237_v50 }
 0x198   :  { %v623_v58 = vpack.c.bf16 %v2239_v57, %v2236_v47 }
 0x19a   :  { %v2240_v59 = vpop.f32.mrb[20].mxu0  ;;  %2586 = vmatprep.mubr.bf16.mxu1 %v623_v58 }
 0x19b   :  { %v2241_v60 = vpop.f32.mrb[21].mxu0 }
 0x19c   :  { %v2242_v61 = vadd.f32 %v2241_v60, %v2240_v59  ;;  %v2243_v62 = vpop.f32.mrb[22].mxu0 }
 0x19d   :  { %v2244_v63 = vpop.f32.mrb[23].mxu0 }
 0x19e   :  { %v2245_v0 = vadd.f32 %v2244_v63, %v2243_v62 }
 0x1a0   :  { %v624_v1 = vpack.c.bf16 %v2245_v0, %v2242_v61 }
 0x1a2   :  { %v2246_v2 = vpop.f32.mrb[24].mxu0  ;;  %2587 = vmatmul.mubr.bf16.gmra.mrb[8].mxu1 %v624_v1 }
 0x1a3   :  { %v2247_v3 = vpop.f32.mrb[25].mxu0 }
 0x1a4   :  { %v2248_v4 = vadd.f32 %v2247_v3, %v2246_v2  ;;  %v2249_v5 = vpop.f32.mrb[26].mxu0 }
 0x1a5   :  { %v2250_v6 = vpop.f32.mrb[27].mxu0 }
 0x1a6   :  { %v2251_v7 = vadd.f32 %v2250_v6, %v2249_v5 }
 0x1a8   :  { %v625_v8 = vpack.c.bf16 %v2251_v7, %v2248_v4 }
 0x1aa   :  { %v2252_v9 = vpop.f32.mrb[28].mxu0  ;;  %2590 = vmatprep.mubr.bf16.mxu1 %v625_v8 }
 0x1ab   :  { %v2253_v10 = vpop.f32.mrb[29].mxu0 }
 0x1ac   :  { %v2254_v12 = vadd.f32 %v2253_v10, %v2252_v9  ;;  %v2255_v13 = vpop.f32.mrb[30].mxu0 }
 0x1ad   :  { %v2256_v14 = vpop.f32.mrb[31].mxu0 }
 0x1ae   :  { %v2257_v15 = vadd.f32 %v2256_v14, %v2255_v13 }
 0x1b0   :  { %v626_v16 = vpack.c.bf16 %v2257_v15, %v2254_v12 }
 0x1b2   :  { %v2258_v21 = vpop.f32.mrb[32].mxu0  ;;  %2591 = vmatmul.mubr.bf16.gmra.mrb[12].mxu1 %v626_v16 }
 0x1b3   :  { %v2259_v22 = vpop.f32.mrb[33].mxu0 }
 0x1b4   :  { %v2260_v23 = vadd.f32 %v2259_v22, %v2258_v21  ;;  %v2261_v25 = vpop.f32.mrb[34].mxu0 }
 0x1b5   :  { %v2262_v43 = vpop.f32.mrb[35].mxu0 }
 0x1b6   :  { %v2263_v46 = vadd.f32 %v2262_v43, %v2261_v25 }
 0x1b8   :  { %v627_v47 = vpack.c.bf16 %v2263_v46, %v2260_v23 }
 0x1ba   :  { %v2264_v50 = vpop.f32.mrb[36].mxu0  ;;  %2594 = vmatprep.mubr.bf16.mxu1 %v627_v47 }
 0x1bb   :  { %v2265_v56 = vpop.f32.mrb[37].mxu0 }
 0x1bc   :  { %v2266_v57 = vadd.f32 %v2265_v56, %v2264_v50  ;;  %v2267_v58 = vpop.f32.mrb[38].mxu0 }
 0x1bd   :  { %v2268_v59 = vpop.f32.mrb[39].mxu0 }
 0x1be   :  { %v2269_v60 = vadd.f32 %v2268_v59, %v2267_v58 }
 0x1c0   :  { %v628_v61 = vpack.c.bf16 %v2269_v60, %v2266_v57 }
 0x1c2   :  { %v2270_v62 = vpop.f32.mrb[40].mxu0  ;;  %2595 = vmatmul.mubr.bf16.gmra.mrb[16].mxu1 %v628_v61 }
 0x1c3   :  { %v2271_v63 = vpop.f32.mrb[41].mxu0 }
 0x1c4   :  { %v2272_v0 = vadd.f32 %v2271_v63, %v2270_v62  ;;  %v2273_v1 = vpop.f32.mrb[42].mxu0 }
 0x1c5   :  { %v2274_v2 = vpop.f32.mrb[43].mxu0 }
 0x1c6   :  { %v2275_v3 = vadd.f32 %v2274_v2, %v2273_v1 }
 0x1c8   :  { %v629_v4 = vpack.c.bf16 %v2275_v3, %v2272_v0 }
 0x1ca   :  { %v2276_v5 = vpop.f32.mrb[44].mxu0  ;;  %2598 = vmatprep.mubr.bf16.mxu1 %v629_v4 }
 0x1cb   :  { %v2277_v6 = vpop.f32.mrb[45].mxu0 }
 0x1cc   :  { %v2278_v7 = vadd.f32 %v2277_v6, %v2276_v5  ;;  %v2279_v8 = vpop.f32.mrb[46].mxu0 }
 0x1cd   :  { %v2280_v9 = vpop.f32.mrb[47].mxu0 }
 0x1ce   :  { %v2281_v10 = vadd.f32 %v2280_v9, %v2279_v8  ;;  %v3475_v8 = vld [vmem:[%s3700_s4] ss:$0 sm:$0xff] }
 0x1d0   :  { %v630_v12 = vpack.c.bf16 %v2281_v10, %v2278_v7 }
 0x1d2   :  { %v2282_v13 = vpop.f32.mrb[48].mxu0  ;;  %2599 = vmatmul.mubr.bf16.gmra.mrb[20].mxu1 %v630_v12 }
 0x1d3   :  { %v2283_v14 = vpop.f32.mrb[49].mxu0 }
 0x1d4   :  { %v2284_v15 = vadd.f32 %v2283_v14, %v2282_v13  ;;  %v2285_v16 = vpop.f32.mrb[50].mxu0 }
 0x1d5   :  { %v2286_v21 = vpop.f32.mrb[51].mxu0 }
 0x1d6   :  { %v2287_v22 = vadd.f32 %v2286_v21, %v2285_v16 }
 0x1d8   :  { %v631_v23 = vpack.c.bf16 %v2287_v22, %v2284_v15 }
 0x1da   :  { %v2288_v25 = vpop.f32.mrb[52].mxu0  ;;  %2602 = vmatprep.mubr.bf16.mxu1 %v631_v23 }
 0x1db   :  { %v2289_v43 = vpop.f32.mrb[53].mxu0 }
 0x1dc   :  { %v2290_v46 = vadd.f32 %v2289_v43, %v2288_v25  ;;  %v2291_v47 = vpop.f32.mrb[54].mxu0 }
 0x1dd   :  { %v2292_v50 = vpop.f32.mrb[55].mxu0 }
 0x1de   :  { %v2293_v56 = vadd.f32 %v2292_v50, %v2291_v47 }
 0x1e0   :  { %v632_v57 = vpack.c.bf16 %v2293_v56, %v2290_v46 }
 0x1e2   :  { %v2294_v58 = vpop.f32.mrb[56].mxu0  ;;  %2603 = vmatmul.mubr.bf16.gmra.mrb[24].mxu1 %v632_v57 }
 0x1e3   :  { %v2295_v59 = vpop.f32.mrb[57].mxu0 }
 0x1e4   :  { %v2296_v60 = vadd.f32 %v2295_v59, %v2294_v58  ;;  %v2297_v61 = vpop.f32.mrb[58].mxu0 }
 0x1e5   :  { %v2298_v62 = vpop.f32.mrb[59].mxu0 }
 0x1e6   :  { %v2299_v63 = vadd.f32 %v2298_v62, %v2297_v61 }
 0x1e8   :  { %v633_v0 = vpack.c.bf16 %v2299_v63, %v2296_v60 }
 0x1ea   :  { %v2300_v1 = vpop.f32.mrb[60].mxu0  ;;  %2606 = vmatprep.mubr.bf16.mxu1 %v633_v0 }
 0x1eb   :  { %v2301_v2 = vpop.f32.mrb[61].mxu0 }
 0x1ec   :  { %v2302_v3 = vadd.f32 %v2301_v2, %v2300_v1  ;;  %v2303_v4 = vpop.f32.mrb[62].mxu0 }
 0x1ed   :  { %v2304_v5 = vpop.f32.mrb[63].mxu0 }
 0x1ee   :  { %v2305_v6 = vadd.f32 %v2304_v5, %v2303_v4 }
 0x1f0   :  { %v634_v7 = vpack.c.bf16 %v2305_v6, %v2302_v3 }
 0x1f2   :  { %2607 = vmatmul.mubr.bf16.gmra.mrb[28].mxu1 %v634_v7 }
 0x1f3   :  { %947 = vmatprep.mubr.bf16.mxu1 %v3375_v11 }
 0x255   :  { %v2580_v9 = vpop.f32.mrb[0].mxu1 }
 0x256   :  { %v749_v10 = vadd.f32 %v2580_v9, %v3475_v8  ;;  %v740_v12 = vpop.f32.mrb[1].mxu1 }
 0x257   :  { %v741_v13 = vadd.f32 %v3475_v8, %v740_v12  ;;  %v2581_v14 = vpop.f32.mrb[2].mxu1 }
 0x258   :  { %v752_v15 = vadd.f32 %v2581_v14, %v3475_v8  ;;  %v743_v16 = vpop.f32.mrb[3].mxu1  ;;  %v869_v22 = vmax.f32 %v749_v10, 0.0 }
 0x259   :  { %v744_v21 = vadd.f32 %v3475_v8, %v743_v16  ;;  %v867_v11 = vmax.f32 %v741_v13, 0.0 }
 0x25a   :  { %v870_v23 = vmax.f32 %v752_v15, 0.0 }
 0x25b   :  { %v868_v25 = vmax.f32 %v744_v21, 0.0 }
 0x25c   :  { %v900_v43 = vpack.c.bf16 %v870_v23, %v869_v22 }
 0x25d   :  { %v899_v46 = vpack.c.bf16 %v868_v25, %v867_v11 }
 0x265   :  { %v2584_v47 = vpop.f32.mrb[4].mxu1 }
 0x266   :  { %v765_v50 = vadd.f32 %v2584_v47, %v3475_v8  ;;  %v756_v56 = vpop.f32.mrb[5].mxu1 }
 0x267   :  { %v757_v57 = vadd.f32 %v3475_v8, %v756_v56  ;;  %v2585_v58 = vpop.f32.mrb[6].mxu1 }
 0x268   :  { %v768_v59 = vadd.f32 %v2585_v58, %v3475_v8  ;;  %v759_v60 = vpop.f32.mrb[7].mxu1  ;;  %v873_v62 = vmax.f32 %v765_v50, 0.0 }
 0x269   :  { %v760_v61 = vadd.f32 %v3475_v8, %v759_v60  ;;  %v871_v0 = vmax.f32 %v757_v57, 0.0 }
 0x26a   :  { %v874_v63 = vmax.f32 %v768_v59, 0.0 }
 0x26b   :  { %v872_v1 = vmax.f32 %v760_v61, 0.0 }
 0x26c   :  { %v3485_v2 = vpack.c.bf16 %v874_v63, %v873_v62 }
 0x26d   :  { %v901_v3 = vpack.c.bf16 %v872_v1, %v871_v0 }
 0x275   :  { %v2588_v4 = vpop.f32.mrb[8].mxu1 }
 0x276   :  { %v781_v5 = vadd.f32 %v2588_v4, %v3475_v8  ;;  %v772_v6 = vpop.f32.mrb[9].mxu1 }
 0x277   :  { %v773_v7 = vadd.f32 %v3475_v8, %v772_v6  ;;  %v2589_v9 = vpop.f32.mrb[10].mxu1 }
 0x278   :  { %v784_v10 = vadd.f32 %v2589_v9, %v3475_v8  ;;  %v775_v12 = vpop.f32.mrb[11].mxu1  ;;  %v877_v14 = vmax.f32 %v781_v5, 0.0 }
 0x279   :  { %v776_v13 = vadd.f32 %v3475_v8, %v775_v12  ;;  %v875_v16 = vmax.f32 %v773_v7, 0.0 }
 0x27a   :  { %v878_v15 = vmax.f32 %v784_v10, 0.0 }
 0x27b   :  { %v876_v21 = vmax.f32 %v776_v13, 0.0 }
 0x27c   :  { %v3491_v22 = vpack.c.bf16 %v878_v15, %v877_v14 }
 0x27d   :  { %v3493_v23 = vpack.c.bf16 %v876_v21, %v875_v16 }
 0x285   :  { %v2592_v11 = vpop.f32.mrb[12].mxu1 }
 0x286   :  { %v797_v25 = vadd.f32 %v2592_v11, %v3475_v8  ;;  %v788_v47 = vpop.f32.mrb[13].mxu1 }
 0x287   :  { %v789_v50 = vadd.f32 %v3475_v8, %v788_v47  ;;  %v2593_v56 = vpop.f32.mrb[14].mxu1 }
 0x288   :  { %v800_v57 = vadd.f32 %v2593_v56, %v3475_v8  ;;  %v791_v58 = vpop.f32.mrb[15].mxu1  ;;  %v881_v60 = vmax.f32 %v797_v25, 0.0 }
 0x289   :  { %v792_v59 = vadd.f32 %v3475_v8, %v791_v58  ;;  %v879_v62 = vmax.f32 %v789_v50, 0.0 }
 0x28a   :  { %v882_v61 = vmax.f32 %v800_v57, 0.0 }
 0x28b   :  { %v880_v63 = vmax.f32 %v792_v59, 0.0 }
 0x28c   :  { %v3499_v0 = vpack.c.bf16 %v882_v61, %v881_v60 }
 0x28d   :  { %v3501_v1 = vpack.c.bf16 %v880_v63, %v879_v62 }
 0x295   :  { %v2596_v4 = vpop.f32.mrb[16].mxu1 }
 0x296   :  { %v813_v5 = vadd.f32 %v2596_v4, %v3475_v8  ;;  %v804_v6 = vpop.f32.mrb[17].mxu1 }
 0x297   :  { %v805_v7 = vadd.f32 %v3475_v8, %v804_v6  ;;  %v2597_v9 = vpop.f32.mrb[18].mxu1 }
 0x298   :  { %v816_v10 = vadd.f32 %v2597_v9, %v3475_v8  ;;  %v807_v12 = vpop.f32.mrb[19].mxu1  ;;  %v885_v14 = vmax.f32 %v813_v5, 0.0 }
 0x299   :  { %v808_v13 = vadd.f32 %v3475_v8, %v807_v12  ;;  %v883_v16 = vmax.f32 %v805_v7, 0.0 }
 0x29a   :  { %v886_v15 = vmax.f32 %v816_v10, 0.0 }
 0x29b   :  { %v884_v21 = vmax.f32 %v808_v13, 0.0 }
 0x29c   :  { %v908_v11 = vpack.c.bf16 %v886_v15, %v885_v14 }
 0x29d   :  { %v907_v25 = vpack.c.bf16 %v884_v21, %v883_v16 }
 0x29f   :  { %2330 = vmatprep.subr.bf16.mxu1 %v907_v25 }
 0x2a0   :  { %2331 = vmatpush3.bf16.msra.mxu1 %v899_v46 }
 0x2a1   :  { %2332 = vmatprep.subr.bf16.mxu1 %v908_v11 }
 0x2a4   :  { %2333 = vmatpush3.bf16.msra.mxu1 %v900_v43 }
 0x2a5   :  { %v2600_v47 = vpop.f32.mrb[20].mxu1 }
 0x2a6   :  { %v829_v50 = vadd.f32 %v2600_v47, %v3475_v8  ;;  %v820_v56 = vpop.f32.mrb[21].mxu1 }
 0x2a7   :  { %v821_v57 = vadd.f32 %v3475_v8, %v820_v56  ;;  %v2601_v58 = vpop.f32.mrb[22].mxu1 }
 0x2a8   :  { %v832_v59 = vadd.f32 %v2601_v58, %v3475_v8  ;;  %v823_v60 = vpop.f32.mrb[23].mxu1  ;;  %v889_v62 = vmax.f32 %v829_v50, 0.0 }
 0x2a9   :  { %v824_v61 = vadd.f32 %v3475_v8, %v823_v60  ;;  %v887_v4 = vmax.f32 %v821_v57, 0.0 }
 0x2aa   :  { %v890_v63 = vmax.f32 %v832_v59, 0.0 }
 0x2ab   :  { %v888_v5 = vmax.f32 %v824_v61, 0.0 }
 0x2ac   :  { %v910_v6 = vpack.c.bf16 %v890_v63, %v889_v62 }
 0x2ad   :  { %v909_v46 = vpack.c.bf16 %v888_v5, %v887_v4 }
 0x2af   :  { %2334 = vmatprep.subr.bf16.mxu1 %v909_v46  ;;  %v2968_v46 = vld [vmem:[#allocation10 + $0x8] sm:$0xff]  }
 0x2b0   :  { %2335 = vmatpush3.bf16.msra.mxu1 %v901_v3 }
 0x2b1   :  { %2336 = vmatprep.subr.bf16.mxu1 %v910_v6 }
 0x2b4   :  { %2337 = vmatpush3.bf16.msra.mxu1 %v3485_v2 }
 0x2b5   :  { %v2604_v43 = vpop.f32.mrb[24].mxu1 }
 0x2b6   :  { %v845_v7 = vadd.f32 %v2604_v43, %v3475_v8  ;;  %v836_v9 = vpop.f32.mrb[25].mxu1  ;;  %v2969_v43 = vld [vmem:[#allocation10 + $0x10] sm:$0xff]  }
 0x2b7   :  { %v837_v10 = vadd.f32 %v3475_v8, %v836_v9  ;;  %v2605_v12 = vpop.f32.mrb[26].mxu1  ;;  %v2183_v9 = vld [vmem:[#allocation11 + $0x20] sm:$0xff]  }
 0x2b8   :  { %v848_v13 = vadd.f32 %v2605_v12, %v3475_v8  ;;  %v839_v14 = vpop.f32.mrb[27].mxu1  ;;  %v893_v16 = vmax.f32 %v845_v7, 0.0  ;;  %v2971_v7 = vld [vmem:[#allocation10 + $0x20] sm:$0xff]  }
 0x2b9   :  { %v840_v15 = vadd.f32 %v3475_v8, %v839_v14  ;;  %v891_v11 = vmax.f32 %v837_v10, 0.0 }
 0x2ba   :  { %v894_v21 = vmax.f32 %v848_v13, 0.0  ;;  %v2184_v13 = vld [vmem:[#allocation11 + $0x28] sm:$0xff]  }
 0x2bb   :  { %v892_v25 = vmax.f32 %v840_v15, 0.0 }
 0x2bc   :  { %v912_v3 = vpack.c.bf16 %v894_v21, %v893_v16 }
 0x2bd   :  { %v911_v47 = vpack.c.bf16 %v892_v25, %v891_v11 }
 0x2bf   :  { %2338 = vmatprep.subr.bf16.mxu1 %v911_v47 }
 0x2c0   :  { %2339 = vmatpush3.bf16.msra.mxu1 %v3493_v23 }
 0x2c1   :  { %2340 = vmatprep.subr.bf16.mxu1 %v912_v3 }
 0x2c4   :  { %2341 = vmatpush3.bf16.msra.mxu1 %v3491_v22  ;;  %v2967_v22 = vld [vmem:[#allocation10] sm:$0xff]  }
 0x2c5   :  { %v2608_v2 = vpop.f32.mrb[28].mxu1  ;;  %2610 = vmatprep.subr.bf16.mxu0 %v2967_v22 }
 0x2c6   :  { %v861_v50 = vadd.f32 %v2608_v2, %v3475_v8  ;;  %v852_v56 = vpop.f32.mrb[29].mxu1  ;;  %2611 = vmatpush3.bf16.msra.mxu0 %v2967_v22 }
 0x2c7   :  { %v853_v57 = vadd.f32 %v3475_v8, %v852_v56  ;;  %v2609_v58 = vpop.f32.mrb[30].mxu1  ;;  %2612 = vmatprep.subr.bf16.mxu0 %v2968_v46 }
 0x2c8   :  { %v864_v59 = vadd.f32 %v2609_v58, %v3475_v8  ;;  %v855_v60 = vpop.f32.mrb[31].mxu1  ;;  %v897_v62 = vmax.f32 %v861_v50, 0.0 }
 0x2c9   :  { %v856_v61 = vadd.f32 %v3475_v8, %v855_v60  ;;  %v895_v4 = vmax.f32 %v853_v57, 0.0  ;;  %v2970_v8 = vld [vmem:[#allocation10 + $0x18] sm:$0xff]  }
 0x2ca   :  { %v898_v63 = vmax.f32 %v864_v59, 0.0  ;;  %2613 = vmatpush3.bf16.msra.mxu0 %v2968_v46 }
 0x2cb   :  { %v896_v5 = vmax.f32 %v856_v61, 0.0  ;;  %2614 = vmatprep.subr.bf16.mxu0 %v2969_v43 }
 0x2cc   :  { %v914_v23 = vpack.c.bf16 %v898_v63, %v897_v62 }
 0x2cd   :  { %v913_v6 = vpack.c.bf16 %v896_v5, %v895_v4 }
 0x2ce   :  { %2615 = vmatpush3.bf16.msra.mxu0 %v2969_v43 }
 0x2cf   :  { %2342 = vmatprep.subr.bf16.mxu1 %v913_v6  ;;  %2616 = vmatprep.subr.bf16.mxu0 %v2970_v8 }
 0x2d0   :  { %2343 = vmatpush3.bf16.msra.mxu1 %v3501_v1 }
 0x2d1   :  { %2344 = vmatprep.subr.bf16.mxu1 %v914_v23 }
 0x2d2   :  { %2617 = vmatpush3.bf16.msra.mxu0 %v2970_v8 }
 0x2d3   :  { %2618 = vmatprep.subr.bf16.mxu0 %v2971_v7 }
 0x2d4   :  { %2345 = vmatpush3.bf16.msra.mxu1 %v3499_v0 }
 0x2d6   :  { %2619 = vmatpush3.bf16.msra.mxu0 %v2971_v7 }
 0x2d7   :  { %948 = vmatmul.mubr.bf16.vlgmr.msra.gmra.mrb[32].mxu1 %v3378_v17  ;;  %v2972_v17 = vld [vmem:[#allocation10 + $0x28] sm:$0xff]  }
 0x2d8   :  { %955 = vmatprep.mubr.bf16.mxu1 %v3380_v18  ;;  %2620 = vmatprep.subr.bf16.mxu0 %v2972_v17  ;;  %v2973_v18 = vld [vmem:[#allocation10 + $0x30] sm:$0xff]  }
 0x2da   :  { %2621 = vmatpush3.bf16.msra.mxu0 %v2972_v17 }
 0x2db   :  { %2622 = vmatprep.subr.bf16.mxu0 %v2973_v18 }
 0x2de   :  { %2623 = vmatpush3.bf16.msra.mxu0 %v2973_v18 }
 0x2df   :  { %956 = vmatmul.mubr.bf16.gmra.mrb[36].mxu1 %v3384_v19  ;;  %v2974_v19 = vld [vmem:[#allocation10 + $0x38] sm:$0xff]  }
 0x2e0   :  { %963 = vmatprep.mubr.bf16.mxu1 %v3386_v20  ;;  %2624 = vmatprep.subr.bf16.mxu0 %v2974_v19 }
 0x2e2   :  { %2625 = vmatpush3.bf16.msra.mxu0 %v2974_v19 }
 0x2e7   :  { %964 = vmatmul.mubr.bf16.gmra.mrb[40].mxu1 %v3390_v24  ;;  %v2117_v24 = vld [vmem:[#allocation11] sm:$0xff]  }
 0x2e8   :  { %971 = vmatprep.mubr.bf16.mxu1 %v3392_v26  ;;  %2819 = vmatprep.subr.bf16.mxu0 %v2117_v24 }
 0x2ef   :  { %972 = vmatmul.mubr.bf16.gmra.mrb[44].mxu1 %v3396_v27 }
 0x2f0   :  { %979 = vmatprep.mubr.bf16.mxu1 %v3398_v28 }
 0x2f7   :  { %980 = vmatmul.mubr.bf16.gmra.mrb[48].mxu1 %v3402_v29 }
 0x2f8   :  { %987 = vmatprep.mubr.bf16.mxu1 %v3404_v30 }
 0x2ff   :  { %988 = vmatmul.mubr.bf16.gmra.mrb[52].mxu1 %v3408_v31 }
 0x300   :  { %995 = vmatprep.mubr.bf16.mxu1 %v3410_v32 }
 0x307   :  { %996 = vmatmul.mubr.bf16.gmra.mrb[56].mxu1 %v3414_v33 }
 0x308   :  { %1003 = vmatprep.mubr.bf16.mxu1 %v3416_v34 }
 0x30f   :  { %1004 = vmatmul.mubr.bf16.gmra.mrb[60].mxu1 %v3420_v35 }
 0x310   :  { %1011 = vmatprep.mubr.bf16.mxu1 %v3422_v36 }
 0x317   :  { %1012 = vmatmul.mubr.bf16.gmra.mrb[64].mxu1 %v3426_v37 }
 0x318   :  { %1019 = vmatprep.mubr.bf16.mxu1 %v3428_v38 }
 0x31f   :  { %1020 = vmatmul.mubr.bf16.gmra.mrb[68].mxu1 %v3432_v39  ;;  %v2180_v39 = vld [vmem:[#allocation11 + $0x8] sm:$0xff]  }
 0x320   :  { %1027 = vmatprep.mubr.bf16.mxu1 %v3434_v40 }
 0x327   :  { %1028 = vmatmul.mubr.bf16.gmra.mrb[72].mxu1 %v3438_v41 }
 0x328   :  { %1035 = vmatprep.mubr.bf16.mxu1 %v3440_v42 }
 0x32f   :  { %1036 = vmatmul.mubr.bf16.gmra.mrb[76].mxu1 %v3444_v44 }
 0x330   :  { %1043 = vmatprep.mubr.bf16.mxu1 %v3446_v45 }
 0x337   :  { %1044 = vmatmul.mubr.bf16.gmra.mrb[80].mxu1 %v3450_v48  ;;  %v2181_v48 = vld [vmem:[#allocation11 + $0x10] sm:$0xff]  }
 0x338   :  { %1051 = vmatprep.mubr.bf16.mxu1 %v3452_v49 }
 0x33f   :  { %1052 = vmatmul.mubr.bf16.gmra.mrb[84].mxu1 %v3456_v51 }
 0x340   :  { %1059 = vmatprep.mubr.bf16.mxu1 %v3458_v52  ;;  %v2182_v52 = vld [vmem:[#allocation11 + $0x18] sm:$0xff]  }
 0x347   :  { %1060 = vmatmul.mubr.bf16.gmra.mrb[88].mxu1 %v3462_v53 }
 0x348   :  { %1067 = vmatprep.mubr.bf16.mxu1 %v3464_v54 }
 0x34f   :  { %1068 = vmatmul.mubr.bf16.gmra.mrb[92].mxu1 %v3468_v55 }
 0x3aa   :  { %v2346_v20 = vpop.f32.mrb[32].mxu1 }
 0x3ab   :  { %v2347_v26 = vpop.f32.mrb[33].mxu1 }
 0x3ac   :  { %v2348_v27 = vadd.f32 %v2347_v26, %v2346_v20  ;;  %v2349_v28 = vpop.f32.mrb[34].mxu1 }
 0x3ad   :  { %v2350_v29 = vpop.f32.mrb[35].mxu1 }
 0x3ae   :  { %v2351_v30 = vadd.f32 %v2350_v29, %v2349_v28 }
 0x3b0   :  { %v1076_v31 = vpack.c.bf16 %v2351_v30, %v2348_v27 }
 0x3b2   :  { %v2352_v32 = vpop.f32.mrb[36].mxu1  ;;  %2626 = vmatprep.mubr.bf16.mxu0 %v1076_v31 }
 0x3b3   :  { %v2353_v33 = vpop.f32.mrb[37].mxu1 }
 0x3b4   :  { %v2354_v34 = vadd.f32 %v2353_v33, %v2352_v32  ;;  %v2355_v35 = vpop.f32.mrb[38].mxu1 }
 0x3b5   :  { %v2356_v36 = vpop.f32.mrb[39].mxu1 }
 0x3b6   :  { %v2357_v37 = vadd.f32 %v2356_v36, %v2355_v35 }
 0x3b8   :  { %v1077_v38 = vpack.c.bf16 %v2357_v37, %v2354_v34 }
 0x3ba   :  { %2627 = vmatmul.mubr.bf16.vlgmr.msra.gmra.mrb[64].mxu0 %v1077_v38  ;;  %v2358_v40 = vpop.f32.mrb[40].mxu1 }
 0x3bb   :  { %v2359_v41 = vpop.f32.mrb[41].mxu1  ;;  %2821 = vmatpush3.bf16.msra.mxu0 %v2117_v24 }
 0x3bc   :  { %v2360_v42 = vadd.f32 %v2359_v41, %v2358_v40  ;;  %v2361_v44 = vpop.f32.mrb[42].mxu1  ;;  %2823 = vmatprep.subr.bf16.mxu0 %v2180_v39 }
 0x3bd   :  { %v2362_v45 = vpop.f32.mrb[43].mxu1 }
 0x3be   :  { %v2363_v49 = vadd.f32 %v2362_v45, %v2361_v44 }
 0x3bf   :  { %2825 = vmatpush3.bf16.msra.mxu0 %v2180_v39 }
 0x3c0   :  { %v1078_v51 = vpack.c.bf16 %v2363_v49, %v2360_v42  ;;  %2827 = vmatprep.subr.bf16.mxu0 %v2181_v48 }
 0x3c2   :  { %v2364_v53 = vpop.f32.mrb[44].mxu1  ;;  %2630 = vmatprep.mubr.bf16.mxu0 %v1078_v51 }
 0x3c3   :  { %v2365_v54 = vpop.f32.mrb[45].mxu1  ;;  %2829 = vmatpush3.bf16.msra.mxu0 %v2181_v48 }
 0x3c4   :  { %v2366_v55 = vadd.f32 %v2365_v54, %v2364_v53  ;;  %v2367_v0 = vpop.f32.mrb[46].mxu1  ;;  %2831 = vmatprep.subr.bf16.mxu0 %v2182_v52 }
 0x3c5   :  { %v2368_v1 = vpop.f32.mrb[47].mxu1 }
 0x3c6   :  { %v2369_v10 = vadd.f32 %v2368_v1, %v2367_v0 }
 0x3c7   :  { %2833 = vmatpush3.bf16.msra.mxu0 %v2182_v52 }
 0x3c8   :  { %v1079_v12 = vpack.c.bf16 %v2369_v10, %v2366_v55  ;;  %2835 = vmatprep.subr.bf16.mxu0 %v2183_v9 }
 0x3ca   :  { %2631 = vmatmul.mubr.bf16.gmra.mrb[68].mxu0 %v1079_v12  ;;  %v2370_v14 = vpop.f32.mrb[48].mxu1 }
 0x3cb   :  { %v2371_v15 = vpop.f32.mrb[49].mxu1  ;;  %2837 = vmatpush3.bf16.msra.mxu0 %v2183_v9  ;;  %v2185_v9 = vld [vmem:[#allocation11 + $0x30] sm:$0xff]  }
 0x3cc   :  { %v2372_v16 = vadd.f32 %v2371_v15, %v2370_v14  ;;  %v2373_v21 = vpop.f32.mrb[50].mxu1  ;;  %2839 = vmatprep.subr.bf16.mxu0 %v2184_v13  ;;  %v2186_v14 = vld [vmem:[#allocation11 + $0x38] sm:$0xff]  }
 0x3cd   :  { %v2374_v11 = vpop.f32.mrb[51].mxu1 }
 0x3ce   :  { %v2375_v25 = vadd.f32 %v2374_v11, %v2373_v21 }
 0x3cf   :  { %2841 = vmatpush3.bf16.msra.mxu0 %v2184_v13 }
 0x3d0   :  { %v1080_v3 = vpack.c.bf16 %v2375_v25, %v2372_v16  ;;  %2843 = vmatprep.subr.bf16.mxu0 %v2185_v9 }
 0x3d2   :  { %v2376_v47 = vpop.f32.mrb[52].mxu1  ;;  %2634 = vmatprep.mubr.bf16.mxu0 %v1080_v3 }
 0x3d3   :  { %v2377_v2 = vpop.f32.mrb[53].mxu1  ;;  %2845 = vmatpush3.bf16.msra.mxu0 %v2185_v9 }
 0x3d4   :  { %v2378_v50 = vadd.f32 %v2377_v2, %v2376_v47  ;;  %v2379_v56 = vpop.f32.mrb[54].mxu1  ;;  %2847 = vmatprep.subr.bf16.mxu0 %v2186_v14 }
 0x3d5   :  { %v2380_v57 = vpop.f32.mrb[55].mxu1 }
 0x3d6   :  { %v2381_v58 = vadd.f32 %v2380_v57, %v2379_v56 }
 0x3d7   :  { %2849 = vmatpush3.bf16.msra.mxu0 %v2186_v14 }
 0x3d8   :  { %v1081_v59 = vpack.c.bf16 %v2381_v58, %v2378_v50 }
 0x3da   :  { %2635 = vmatmul.mubr.bf16.gmra.mrb[72].mxu0 %v1081_v59  ;;  %v2382_v60 = vpop.f32.mrb[56].mxu1 }
 0x3db   :  { %v2383_v61 = vpop.f32.mrb[57].mxu1 }
 0x3dc   :  { %v2384_v62 = vadd.f32 %v2383_v61, %v2382_v60  ;;  %v2385_v63 = vpop.f32.mrb[58].mxu1 }
 0x3dd   :  { %v2386_v4 = vpop.f32.mrb[59].mxu1 }
 0x3de   :  { %v2387_v5 = vadd.f32 %v2386_v4, %v2385_v63 }
 0x3e0   :  { %v1082_v23 = vpack.c.bf16 %v2387_v5, %v2384_v62 }
 0x3e2   :  { %v2388_v6 = vpop.f32.mrb[60].mxu1  ;;  %2638 = vmatprep.mubr.bf16.mxu0 %v1082_v23 }
 0x3e3   :  { %v2389_v22 = vpop.f32.mrb[61].mxu1 }
 0x3e4   :  { %v2390_v46 = vadd.f32 %v2389_v22, %v2388_v6  ;;  %v2391_v43 = vpop.f32.mrb[62].mxu1  ;;  %v2149_v22 = vld [vmem:[#allocation13] sm:$0xff]  }
 0x3e5   :  { %v2392_v8 = vpop.f32.mrb[63].mxu1  ;;  %2851 = vmatprep.subr.bf16.mxu1 %v2149_v22 }
 0x3e6   :  { %v2393_v7 = vadd.f32 %v2392_v8, %v2391_v43  ;;  %v3558_v43 = vld [vmem:[%s3702_s6] ss:$0 sm:$0xff]  ;;  %2853 = vmatpush3.bf16.msra.mxu1 %v2149_v22 }
 0x3e8   :  { %v1083_v17 = vpack.c.bf16 %v2393_v7, %v2390_v46  ;;  %v2187_v46 = vld [vmem:[#allocation13 + $0x8] sm:$0xff]   ;;  %v1326_v7 = vld [vmem:[#allocation7 + $0x10] sm:$0xff] }
 0x3e9   :  { %2855 = vmatprep.subr.bf16.mxu1 %v2187_v46 }
 0x3ea   :  { %2639 = vmatmul.mubr.bf16.gmra.mrb[76].mxu0 %v1083_v17  ;;  %v2394_v18 = vpop.f32.mrb[64].mxu1  ;;  %v2188_v17 = vld [vmem:[#allocation13 + $0x10] sm:$0xff]   ;;  %2857 = vmatpush3.bf16.msra.mxu1 %v2187_v46 }
 0x3eb   :  { %v2395_v19 = vpop.f32.mrb[65].mxu1  ;;  %2859 = vmatprep.subr.bf16.mxu1 %v2188_v17 }
 0x3ec   :  { %v2396_v20 = vadd.f32 %v2395_v19, %v2394_v18  ;;  %v2397_v24 = vpop.f32.mrb[66].mxu1 }
 0x3ed   :  { %v2398_v26 = vpop.f32.mrb[67].mxu1 }
 0x3ee   :  { %v2399_v27 = vadd.f32 %v2398_v26, %v2397_v24  ;;  %2861 = vmatpush3.bf16.msra.mxu1 %v2188_v17 }
 0x3f0   :  { %v1084_v28 = vpack.c.bf16 %v2399_v27, %v2396_v20  ;;  %v1324_v20 = vld [vmem:[#allocation7] sm:$0xff]  ;;  %v1327_v27 = vld [vmem:[#allocation7 + $0x18] sm:$0xff] }
 0x3f2   :  { %v2400_v29 = vpop.f32.mrb[68].mxu1  ;;  %2642 = vmatprep.mubr.bf16.mxu0 %v1084_v28 }
 0x3f3   :  { %v2401_v30 = vpop.f32.mrb[69].mxu1 }
 0x3f4   :  { %v2402_v31 = vadd.f32 %v2401_v30, %v2400_v29  ;;  %v2403_v32 = vpop.f32.mrb[70].mxu1 }
 0x3f5   :  { %v2404_v33 = vpop.f32.mrb[71].mxu1 }
 0x3f6   :  { %v2405_v34 = vadd.f32 %v2404_v33, %v2403_v32 }
 0x3f8   :  { %v1085_v35 = vpack.c.bf16 %v2405_v34, %v2402_v31  ;;  %v1325_v31 = vld [vmem:[#allocation7 + $0x8] sm:$0xff]  ;;  %v2189_v34 = vld [vmem:[#allocation13 + $0x18] sm:$0xff]  }
 0x3f9   :  { %2863 = vmatprep.subr.bf16.mxu1 %v2189_v34 }
 0x3fa   :  { %2643 = vmatmul.mubr.bf16.gmra.mrb[80].mxu0 %v1085_v35  ;;  %v2406_v36 = vpop.f32.mrb[72].mxu1  ;;  %2865 = vmatpush3.bf16.msra.mxu1 %v2189_v34 }
 0x3fb   :  { %v2407_v37 = vpop.f32.mrb[73].mxu1 }
 0x3fc   :  { %v2408_v38 = vadd.f32 %v2407_v37, %v2406_v36  ;;  %v2409_v39 = vpop.f32.mrb[74].mxu1  ;;  %v2190_v37 = vld [vmem:[#allocation13 + $0x20] sm:$0xff]  }
 0x3fd   :  { %v2410_v40 = vpop.f32.mrb[75].mxu1  ;;  %2867 = vmatprep.subr.bf16.mxu1 %v2190_v37 }
 0x3fe   :  { %v2411_v41 = vadd.f32 %v2410_v40, %v2409_v39  ;;  %2869 = vmatpush3.bf16.msra.mxu1 %v2190_v37  ;;  %v1330_v40 = vld [vmem:[#allocation7 + $0x30] sm:$0xff] }
 0x400   :  { %v1086_v42 = vpack.c.bf16 %v2411_v41, %v2408_v38  ;;  %v2191_v38 = vld [vmem:[#allocation13 + $0x28] sm:$0xff]   ;;  %v2192_v41 = vld [vmem:[#allocation13 + $0x30] sm:$0xff]  }
 0x401   :  { %2871 = vmatprep.subr.bf16.mxu1 %v2191_v38 }
 0x402   :  { %v2412_v44 = vpop.f32.mrb[76].mxu1  ;;  %2646 = vmatprep.mubr.bf16.mxu0 %v1086_v42  ;;  %2873 = vmatpush3.bf16.msra.mxu1 %v2191_v38 }
 0x403   :  { %v2413_v45 = vpop.f32.mrb[77].mxu1  ;;  %2875 = vmatprep.subr.bf16.mxu1 %v2192_v41 }
 0x404   :  { %v2414_v48 = vadd.f32 %v2413_v45, %v2412_v44  ;;  %v2415_v49 = vpop.f32.mrb[78].mxu1  ;;  %v1328_v45 = vld [vmem:[#allocation7 + $0x20] sm:$0xff] }
 0x405   :  { %v2416_v51 = vpop.f32.mrb[79].mxu1 }
 0x406   :  { %v2417_v52 = vadd.f32 %v2416_v51, %v2415_v49  ;;  %v1331_v51 = vld [vmem:[#allocation7 + $0x38] sm:$0xff]  ;;  %2877 = vmatpush3.bf16.msra.mxu1 %v2192_v41 }
 0x408   :  { %v1087_v53 = vpack.c.bf16 %v2417_v52, %v2414_v48 }
 0x40a   :  { %2647 = vmatmul.mubr.bf16.gmra.mrb[84].mxu0 %v1087_v53  ;;  %v2418_v54 = vpop.f32.mrb[80].mxu1 }
 0x40b   :  { %v2419_v55 = vpop.f32.mrb[81].mxu1 }
 0x40c   :  { %v2420_v0 = vadd.f32 %v2419_v55, %v2418_v54  ;;  %v2421_v1 = vpop.f32.mrb[82].mxu1  ;;  %v1329_v55 = vld [vmem:[#allocation7 + $0x28] sm:$0xff] }
 0x40d   :  { %v2422_v10 = vpop.f32.mrb[83].mxu1 }
 0x40e   :  { %v2423_v12 = vadd.f32 %v2422_v10, %v2421_v1 }
 0x410   :  { %v1088_v13 = vpack.c.bf16 %v2423_v12, %v2420_v0 }
 0x412   :  { %v2424_v15 = vpop.f32.mrb[84].mxu1  ;;  %2650 = vmatprep.mubr.bf16.mxu0 %v1088_v13  ;;  %v1334_v13 = vld [vmem:[#allocation7 + $0x50] sm:$0xff] }
 0x413   :  { %v2425_v16 = vpop.f32.mrb[85].mxu1 }
 0x414   :  { %v2426_v21 = vadd.f32 %v2425_v16, %v2424_v15  ;;  %v2427_v11 = vpop.f32.mrb[86].mxu1  ;;  %v1332_v16 = vld [vmem:[#allocation7 + $0x40] sm:$0xff] }
 0x415   :  { %v2428_v25 = vpop.f32.mrb[87].mxu1 }
 0x416   :  { %v2429_v3 = vadd.f32 %v2428_v25, %v2427_v11  ;;  %v1335_v25 = vld [vmem:[#allocation7 + $0x58] sm:$0xff] }
 0x418   :  { %v1089_v47 = vpack.c.bf16 %v2429_v3, %v2426_v21 }
 0x41a   :  { %2651 = vmatmul.mubr.bf16.gmra.mrb[88].mxu0 %v1089_v47  ;;  %v2430_v2 = vpop.f32.mrb[88].mxu1 }
 0x41b   :  { %v2431_v50 = vpop.f32.mrb[89].mxu1 }
 0x41c   :  { %v2432_v56 = vadd.f32 %v2431_v50, %v2430_v2  ;;  %v2433_v57 = vpop.f32.mrb[90].mxu1  ;;  %v1333_v50 = vld [vmem:[#allocation7 + $0x48] sm:$0xff] }
 0x41d   :  { %v2434_v58 = vpop.f32.mrb[91].mxu1 }
 0x41e   :  { %v2435_v59 = vadd.f32 %v2434_v58, %v2433_v57 }
 0x420   :  { %v1090_v60 = vpack.c.bf16 %v2435_v59, %v2432_v56 }
 0x422   :  { %v2436_v61 = vpop.f32.mrb[92].mxu1  ;;  %2654 = vmatprep.mubr.bf16.mxu0 %v1090_v60 }
 0x423   :  { %v2437_v62 = vpop.f32.mrb[93].mxu1 }
 0x424   :  { %v2438_v63 = vadd.f32 %v2437_v62, %v2436_v61  ;;  %v2439_v4 = vpop.f32.mrb[94].mxu1  ;;  %v1338_v61 = vld [vmem:[#allocation7 + $0x70] sm:$0xff] }
 0x425   :  { %v2440_v5 = vpop.f32.mrb[95].mxu1 }
 0x426   :  { %v2441_v23 = vadd.f32 %v2440_v5, %v2439_v4  ;;  %v1336_v4 = vld [vmem:[#allocation7 + $0x60] sm:$0xff] }
 0x428   :  { %v1091_v6 = vpack.c.bf16 %v2441_v23, %v2438_v63 }
 0x42a   :  { %2655 = vmatmul.mubr.bf16.gmra.mrb[92].mxu0 %v1091_v6  ;;  %v1339_v6 = vld [vmem:[#allocation7 + $0x78] sm:$0xff] }
 0x48d   :  { %v2628_v8 = vpop.f32.mrb[64].mxu0 }
 0x48e   :  { %v1206_v18 = vadd.f32 %v2628_v8, %v3558_v43  ;;  %v1197_v19 = vpop.f32.mrb[65].mxu0 }
 0x48f   :  { %v1198_v24 = vadd.f32 %v3558_v43, %v1197_v19  ;;  %v2629_v26 = vpop.f32.mrb[66].mxu0 }
 0x490   :  { %v1358_v28 = vmul.f32 %v1326_v7, %v1206_v18  ;;  %v1209_v29 = vadd.f32 %v2629_v26, %v3558_v43  ;;  %v1200_v30 = vpop.f32.mrb[67].mxu0  ;;  %v1337_v7 = vld [vmem:[#allocation7 + $0x68] sm:$0xff]  ;;  %v1342_v26 = vld [vmem:[#allocation7 + $0x90] sm:$0xff] }
 0x491   :  { %v1356_v32 = vmul.f32 %v1324_v20, %v1198_v24  ;;  %v1201_v33 = vadd.f32 %v3558_v43, %v1200_v30 }
 0x492   :  { %1390 = vst [vmem:[#allocation15 + $0x10] sm:$0xff] %v1358_v28  ;;  %v1359_v35 = vmul.f32 %v1327_v27, %v1209_v29  ;;  %v1340_v29 = vld [vmem:[#allocation7 + $0x80] sm:$0xff] }
 0x493   :  { %1388 = vst [vmem:[#allocation15] sm:$0xff] %v1356_v32  ;;  %v1357_v36 = vmul.f32 %v1325_v31, %v1201_v33  ;;  %2690 = vmatprep.mubr.f32.mxu0 %v1356_v32  ;;  %v1343_v32 = vld [vmem:[#allocation7 + $0x98] sm:$0xff] }
 0x494   :  { %1391 = vst [vmem:[#allocation15 + $0x18] sm:$0xff] %v1359_v35 }
 0x495   :  { %1389 = vst [vmem:[#allocation15 + $0x8] sm:$0xff] %v1357_v36  ;;  %2691 = vmatmul.mubr.f32.vlgmr.msra.gmra.mrb[96].mxu0 %v1357_v36  ;;  %v1341_v36 = vld [vmem:[#allocation7 + $0x88] sm:$0xff] }
 0x496   :  { %2693 = vmatprep.mubr.f32.mxu0 %v1358_v28 }
 0x499   :  { %2694 = vmatmul.mubr.f32.gmra.mrb[98].mxu0 %v1359_v35 }
 0x49d   :  { %v2632_v39 = vpop.f32.mrb[68].mxu0 }
 0x49e   :  { %v1222_v42 = vadd.f32 %v2632_v39, %v3558_v43  ;;  %v1213_v44 = vpop.f32.mrb[69].mxu0 }
 0x49f   :  { %v1214_v48 = vadd.f32 %v3558_v43, %v1213_v44  ;;  %v2633_v49 = vpop.f32.mrb[70].mxu0 }
 0x4a0   :  { %v1362_v52 = vmul.f32 %v1330_v40, %v1222_v42  ;;  %v1225_v53 = vadd.f32 %v2633_v49, %v3558_v43  ;;  %v1216_v54 = vpop.f32.mrb[71].mxu0  ;;  %v1346_v42 = vld [vmem:[#allocation7 + $0xb0] sm:$0xff] }
 0x4a1   :  { %v1360_v0 = vmul.f32 %v1328_v45, %v1214_v48  ;;  %v1217_v1 = vadd.f32 %v3558_v43, %v1216_v54  ;;  %v1344_v48 = vld [vmem:[#allocation7 + $0xa0] sm:$0xff] }
 0x4a2   :  { %1394 = vst [vmem:[#allocation15 + $0x30] sm:$0xff] %v1362_v52  ;;  %v1363_v9 = vmul.f32 %v1331_v51, %v1225_v53 }
 0x4a3   :  { %1392 = vst [vmem:[#allocation15 + $0x20] sm:$0xff] %v1360_v0  ;;  %v1361_v10 = vmul.f32 %v1329_v55, %v1217_v1  ;;  %2696 = vmatprep.mubr.f32.mxu0 %v1360_v0  ;;  %v1345_v0 = vld [vmem:[#allocation7 + $0xa8] sm:$0xff] }
 0x4a4   :  { %1395 = vst [vmem:[#allocation15 + $0x38] sm:$0xff] %v1363_v9 }
 0x4a5   :  { %1393 = vst [vmem:[#allocation15 + $0x28] sm:$0xff] %v1361_v10  ;;  %2697 = vmatmul.mubr.f32.gmra.mrb[100].mxu0 %v1361_v10 }
 0x4a6   :  { %2699 = vmatprep.mubr.f32.mxu0 %v1362_v52  ;;  %v1347_v52 = vld [vmem:[#allocation7 + $0xb8] sm:$0xff] }
 0x4a9   :  { %2700 = vmatmul.mubr.f32.gmra.mrb[102].mxu0 %v1363_v9 }
 0x4ad   :  { %v2636_v12 = vpop.f32.mrb[72].mxu0 }
 0x4ae   :  { %v1238_v14 = vadd.f32 %v2636_v12, %v3558_v43  ;;  %v1229_v15 = vpop.f32.mrb[73].mxu0 }
 0x4af   :  { %v1230_v21 = vadd.f32 %v3558_v43, %v1229_v15  ;;  %v2637_v11 = vpop.f32.mrb[74].mxu0  ;;  %v1350_v15 = vld [vmem:[#allocation7 + $0xd0] sm:$0xff] }
 0x4b0   :  { %v1366_v3 = vmul.f32 %v1334_v13, %v1238_v14  ;;  %v1241_v47 = vadd.f32 %v2637_v11, %v3558_v43  ;;  %v1232_v2 = vpop.f32.mrb[75].mxu0  ;;  %v2193_v13 = vld [vmem:[#allocation13 + $0x38] sm:$0xff]   ;;  %v1348_v11 = vld [vmem:[#allocation7 + $0xc0] sm:$0xff] }
 0x4b1   :  { %v1364_v56 = vmul.f32 %v1332_v16, %v1230_v21  ;;  %v1233_v57 = vadd.f32 %v3558_v43, %v1232_v2  ;;  %2879 = vmatprep.subr.bf16.mxu1 %v2193_v13 }
 0x4b2   :  { %1398 = vst [vmem:[#allocation15 + $0x50] sm:$0xff] %v1366_v3  ;;  %v1367_v58 = vmul.f32 %v1335_v25, %v1241_v47  ;;  %2881 = vmatpush3.bf16.msra.mxu1 %v2193_v13  ;;  %v1351_v47 = vld [vmem:[#allocation7 + $0xd8] sm:$0xff] }
 0x4b3   :  { %1396 = vst [vmem:[#allocation15 + $0x40] sm:$0xff] %v1364_v56  ;;  %v1365_v59 = vmul.f32 %v1333_v50, %v1233_v57  ;;  %2702 = vmatprep.mubr.f32.mxu0 %v1364_v56  ;;  %v1349_v57 = vld [vmem:[#allocation7 + $0xc8] sm:$0xff] }
 0x4b4   :  { %1399 = vst [vmem:[#allocation15 + $0x58] sm:$0xff] %v1367_v58 }
 0x4b5   :  { %1397 = vst [vmem:[#allocation15 + $0x48] sm:$0xff] %v1365_v59  ;;  %2703 = vmatmul.mubr.f32.gmra.mrb[104].mxu0 %v1365_v59 }
 0x4b6   :  { %2705 = vmatprep.mubr.f32.mxu0 %v1366_v3 }
 0x4b9   :  { %2706 = vmatmul.mubr.f32.gmra.mrb[106].mxu0 %v1367_v58 }
 0x4bd   :  { %v2640_v60 = vpop.f32.mrb[76].mxu0 }
 0x4be   :  { %v1254_v62 = vadd.f32 %v2640_v60, %v3558_v43  ;;  %v1245_v63 = vpop.f32.mrb[77].mxu0 }
 0x4bf   :  { %v1246_v5 = vadd.f32 %v3558_v43, %v1245_v63  ;;  %v2641_v23 = vpop.f32.mrb[78].mxu0  ;;  %v1354_v63 = vld [vmem:[#allocation7 + $0xf0] sm:$0xff] }
 0x4c0   :  { %v1370_v22 = vmul.f32 %v1338_v61, %v1254_v62  ;;  %v1257_v46 = vadd.f32 %v2641_v23, %v3558_v43  ;;  %v1248_v8 = vpop.f32.mrb[79].mxu0  ;;  %v1352_v23 = vld [vmem:[#allocation7 + $0xe0] sm:$0xff] }
 0x4c1   :  { %v1368_v17 = vmul.f32 %v1336_v4, %v1246_v5  ;;  %v1249_v18 = vadd.f32 %v3558_v43, %v1248_v8 }
 0x4c2   :  { %1402 = vst [vmem:[#allocation15 + $0x70] sm:$0xff] %v1370_v22  ;;  %v1371_v19 = vmul.f32 %v1339_v6, %v1257_v46  ;;  %v1355_v46 = vld [vmem:[#allocation7 + $0xf8] sm:$0xff] }
 0x4c3   :  { %1400 = vst [vmem:[#allocation15 + $0x60] sm:$0xff] %v1368_v17  ;;  %v1369_v20 = vmul.f32 %v1337_v7, %v1249_v18  ;;  %2708 = vmatprep.mubr.f32.mxu0 %v1368_v17  ;;  %v1353_v18 = vld [vmem:[#allocation7 + $0xe8] sm:$0xff] }
 0x4c4   :  { %1403 = vst [vmem:[#allocation15 + $0x78] sm:$0xff] %v1371_v19 }
 0x4c5   :  { %1401 = vst [vmem:[#allocation15 + $0x68] sm:$0xff] %v1369_v20  ;;  %2709 = vmatmul.mubr.f32.gmra.mrb[108].mxu0 %v1369_v20 }
 0x4c6   :  { %2711 = vmatprep.mubr.f32.mxu0 %v1370_v22 }
 0x4c9   :  { %2712 = vmatmul.mubr.f32.gmra.mrb[110].mxu0 %v1371_v19 }
 0x4cd   :  { %v2644_v24 = vpop.f32.mrb[80].mxu0 }
 0x4ce   :  { %v1270_v27 = vadd.f32 %v2644_v24, %v3558_v43  ;;  %v1261_v28 = vpop.f32.mrb[81].mxu0 }
 0x4cf   :  { %v1262_v30 = vadd.f32 %v3558_v43, %v1261_v28  ;;  %v2645_v31 = vpop.f32.mrb[82].mxu0 }
 0x4d0   :  { %v1374_v33 = vmul.f32 %v1342_v26, %v1270_v27  ;;  %v1273_v34 = vadd.f32 %v2645_v31, %v3558_v43  ;;  %v1264_v35 = vpop.f32.mrb[83].mxu0  ;;  %v3595_v27 = vld [vmem:[%s3704_s8] ss:$0 sm:$0xff]  ;;  %s3196_s8 = smov [#allocation15]  }
 0x4d1   :  { %v1372_v37 = vmul.f32 %v1340_v29, %v1262_v30  ;;  %v1265_v38 = vadd.f32 %v3558_v43, %v1264_v35  ;;  %s2029_s19 = sshll.u32 %s3196_s8, 4  ;;  %s2030_s19 = int_to_ptr.vmem [resolvable:$true] %s2029_s19 }
 0x4d2   :  { %1406 = vst [vmem:[#allocation15 + $0x90] sm:$0xff] %v1374_v33  ;;  %v1375_v39 = vmul.f32 %v1343_v32, %v1273_v34  ;;  %s3129_s21 = scalar_lea.vmem %s2030_s19, 4096  ;;  %p3134_p1 = scmp.lt.s32.totalorder %s2030_s19, %s2030_s19 }
 0x4d3   :  { %1404 = vst [vmem:[#allocation15 + $0x80] sm:$0xff] %v1372_v37  ;;  %v1373_v40 = vmul.f32 %v1341_v36, %v1265_v38  ;;  %2714 = vmatprep.mubr.f32.mxu0 %v1372_v37  ;;  %p3130_p0 = scmp.ne.s32.totalorder %s2030_s19, %s3129_s21  ;;  %p3135_p2 = scmp.lt.s32.totalorder %s3129_s21, %s3129_s21 }
 0x4d4   :  { %1407 = vst [vmem:[#allocation15 + $0x98] sm:$0xff] %v1375_v39 }
 0x4d5   :  { %1405 = vst [vmem:[#allocation15 + $0x88] sm:$0xff] %v1373_v40  ;;  %2715 = vmatmul.mubr.f32.gmra.mrb[112].mxu0 %v1373_v40  ;;  %p3136_p3 = por %p3135_p2, %p3134_p1 }
 0x4d6   :  { %2717 = vmatprep.mubr.f32.mxu0 %v1374_v33 }
 0x4d7   :  { %p3137_p4 = pnand %p3136_p3, %p3130_p0 }
 0x4d9   :  { %2718 = vmatmul.mubr.f32.gmra.mrb[114].mxu0 %v1375_v39 }
 0x4dd   :  { %v2648_v41 = vpop.f32.mrb[84].mxu0 }
 0x4de   :  { %v1286_v44 = vadd.f32 %v2648_v41, %v3558_v43  ;;  %v1277_v45 = vpop.f32.mrb[85].mxu0 }
 0x4df   :  { %v1278_v49 = vadd.f32 %v3558_v43, %v1277_v45  ;;  %v2649_v51 = vpop.f32.mrb[86].mxu0 }
 0x4e0   :  { %v1378_v53 = vmul.f32 %v1346_v42, %v1286_v44  ;;  %v1289_v54 = vadd.f32 %v2649_v51, %v3558_v43  ;;  %v1280_v55 = vpop.f32.mrb[87].mxu0 }
 0x4e1   :  { %v1376_v1 = vmul.f32 %v1344_v48, %v1278_v49  ;;  %v1281_v9 = vadd.f32 %v3558_v43, %v1280_v55 }
 0x4e2   :  { %1410 = vst [vmem:[#allocation15 + $0xb0] sm:$0xff] %v1378_v53  ;;  %v1379_v10 = vmul.f32 %v1347_v52, %v1289_v54 }
 0x4e3   :  { %1408 = vst [vmem:[#allocation15 + $0xa0] sm:$0xff] %v1376_v1  ;;  %v1377_v12 = vmul.f32 %v1345_v0, %v1281_v9  ;;  %2720 = vmatprep.mubr.f32.mxu0 %v1376_v1 }
 0x4e4   :  { %1411 = vst [vmem:[#allocation15 + $0xb8] sm:$0xff] %v1379_v10 }
 0x4e5   :  { %1409 = vst [vmem:[#allocation15 + $0xa8] sm:$0xff] %v1377_v12  ;;  %2721 = vmatmul.mubr.f32.gmra.mrb[116].mxu0 %v1377_v12 }
 0x4e6   :  { %2723 = vmatprep.mubr.f32.mxu0 %v1378_v53 }
 0x4e9   :  { %2724 = vmatmul.mubr.f32.gmra.mrb[118].mxu0 %v1379_v10 }
 0x4ed   :  { %v2652_v14 = vpop.f32.mrb[88].mxu0 }
 0x4ee   :  { %v1302_v16 = vadd.f32 %v2652_v14, %v3558_v43  ;;  %v1293_v21 = vpop.f32.mrb[89].mxu0 }
 0x4ef   :  { %v1294_v25 = vadd.f32 %v3558_v43, %v1293_v21  ;;  %v2653_v3 = vpop.f32.mrb[90].mxu0 }
 0x4f0   :  { %v1382_v2 = vmul.f32 %v1350_v15, %v1302_v16  ;;  %v1305_v50 = vadd.f32 %v2653_v3, %v3558_v43  ;;  %v1296_v56 = vpop.f32.mrb[91].mxu0 }
 0x4f1   :  { %v1380_v58 = vmul.f32 %v1348_v11, %v1294_v25  ;;  %v1297_v59 = vadd.f32 %v3558_v43, %v1296_v56 }
 0x4f2   :  { %1414 = vst [vmem:[#allocation15 + $0xd0] sm:$0xff] %v1382_v2  ;;  %v1383_v60 = vmul.f32 %v1351_v47, %v1305_v50 }
 0x4f3   :  { %1412 = vst [vmem:[#allocation15 + $0xc0] sm:$0xff] %v1380_v58  ;;  %v1381_v61 = vmul.f32 %v1349_v57, %v1297_v59  ;;  %2726 = vmatprep.mubr.f32.mxu0 %v1380_v58 }
 0x4f4   :  { %1415 = vst [vmem:[#allocation15 + $0xd8] sm:$0xff] %v1383_v60 }
 0x4f5   :  { %1413 = vst [vmem:[#allocation15 + $0xc8] sm:$0xff] %v1381_v61  ;;  %2727 = vmatmul.mubr.f32.gmra.mrb[120].mxu0 %v1381_v61 }
 0x4f6   :  { %2729 = vmatprep.mubr.f32.mxu0 %v1382_v2 }
 0x4f9   :  { %2730 = vmatmul.mubr.f32.gmra.mrb[122].mxu0 %v1383_v60 }
 0x4fd   :  { %v2656_v62 = vpop.f32.mrb[92].mxu0 }
 0x4fe   :  { %v1318_v4 = vadd.f32 %v2656_v62, %v3558_v43  ;;  %v1309_v5 = vpop.f32.mrb[93].mxu0 }
 0x4ff   :  { %v1310_v6 = vadd.f32 %v3558_v43, %v1309_v5  ;;  %v2657_v22 = vpop.f32.mrb[94].mxu0 }
 0x500   :  { %v1386_v8 = vmul.f32 %v1354_v63, %v1318_v4  ;;  %v1321_v7 = vadd.f32 %v2657_v22, %v3558_v43  ;;  %v1312_v17 = vpop.f32.mrb[95].mxu0 }
 0x501   :  { %v1384_v19 = vmul.f32 %v1352_v23, %v1310_v6  ;;  %v1313_v20 = vadd.f32 %v3558_v43, %v1312_v17 }
 0x502   :  { %1418 = vst [vmem:[#allocation15 + $0xf0] sm:$0xff] %v1386_v8  ;;  %v1387_v24 = vmul.f32 %v1355_v46, %v1321_v7 }
 0x503   :  { %1416 = vst [vmem:[#allocation15 + $0xe0] sm:$0xff] %v1384_v19  ;;  %v1385_v26 = vmul.f32 %v1353_v18, %v1313_v20  ;;  %2732 = vmatprep.mubr.f32.mxu0 %v1384_v19 }
 0x504   :  { %1419 = vst [vmem:[#allocation15 + $0xf8] sm:$0xff] %v1387_v24 }
 0x505   :  { %1417 = vst [vmem:[#allocation15 + $0xe8] sm:$0xff] %v1385_v26  ;;  %2733 = vmatmul.mubr.f32.gmra.mrb[124].mxu0 %v1385_v26 }
 0x506   :  { %2735 = vmatprep.mubr.f32.mxu0 %v1386_v8 }
 0x509   :  { %2736 = vmatmul.mubr.f32.gmra.mrb[126].mxu0 %v1387_v24 }
 0x568   :  { %v2692_v28 = vpop.f32.mrb[96].mxu0 }
 0x569   :  { %v1531_v29 = vadd.f32 %v2692_v28, %v3595_v27  ;;  %v1525_v30 = vpop.f32.mrb[97].mxu0 }
 0x56a   :  { %v1526_v43 = vadd.f32 %v3595_v27, %v1525_v30 }
 0x56b   :  { %v1685_v33 = vmax.f32 %v1531_v29, 0.0 }
 0x56c   :  { %v1684_v31 = vmax.f32 %v1526_v43, 0.0  ;;  %v2695_v32 = vpop.f32.mrb[98].mxu0 }
 0x56d   :  { %v1541_v34 = vadd.f32 %v2695_v32, %v3595_v27  ;;  %v1535_v35 = vpop.f32.mrb[99].mxu0 }
 0x56e   :  { %v1536_v36 = vadd.f32 %v3595_v27, %v1535_v35  ;;  %2770 = vmatprep.mubr.f32.mxu1 %v1684_v31 }
 0x56f   :  { %2771 = vmatmul.mubr.f32.vlgmr.msra.gmra.mrb[96].mxu1 %v1685_v33  ;;  %v1687_v38 = vmax.f32 %v1541_v34, 0.0 }
 0x570   :  { %v1686_v37 = vmax.f32 %v1536_v36, 0.0 }
 0x572   :  { %2773 = vmatprep.mubr.f32.mxu1 %v1686_v37 }
 0x573   :  { %2774 = vmatmul.mubr.f32.gmra.mrb[98].mxu1 %v1687_v38 }
 0x578   :  { %v2698_v39 = vpop.f32.mrb[100].mxu0 }
 0x579   :  { %v1551_v40 = vadd.f32 %v2698_v39, %v3595_v27  ;;  %v1545_v41 = vpop.f32.mrb[101].mxu0 }
 0x57a   :  { %v1546_v42 = vadd.f32 %v3595_v27, %v1545_v41 }
 0x57b   :  { %v1689_v48 = vmax.f32 %v1551_v40, 0.0 }
 0x57c   :  { %v1688_v44 = vmax.f32 %v1546_v42, 0.0  ;;  %v2701_v45 = vpop.f32.mrb[102].mxu0 }
 0x57d   :  { %v1561_v49 = vadd.f32 %v2701_v45, %v3595_v27  ;;  %v1555_v51 = vpop.f32.mrb[103].mxu0 }
 0x57e   :  { %v1556_v52 = vadd.f32 %v3595_v27, %v1555_v51  ;;  %2776 = vmatprep.mubr.f32.mxu1 %v1688_v44 }
 0x57f   :  { %2777 = vmatmul.mubr.f32.gmra.mrb[100].mxu1 %v1689_v48  ;;  %v1691_v54 = vmax.f32 %v1561_v49, 0.0 }
 0x580   :  { %v1690_v53 = vmax.f32 %v1556_v52, 0.0 }
 0x582   :  { %2779 = vmatprep.mubr.f32.mxu1 %v1690_v53 }
 0x583   :  { %2780 = vmatmul.mubr.f32.gmra.mrb[102].mxu1 %v1691_v54 }
 0x588   :  { %v2704_v55 = vpop.f32.mrb[104].mxu0 }
 0x589   :  { %v1571_v0 = vadd.f32 %v2704_v55, %v3595_v27  ;;  %v1565_v1 = vpop.f32.mrb[105].mxu0 }
 0x58a   :  { %v1566_v9 = vadd.f32 %v3595_v27, %v1565_v1 }
 0x58b   :  { %v1693_v13 = vmax.f32 %v1571_v0, 0.0 }
 0x58c   :  { %v1692_v10 = vmax.f32 %v1566_v9, 0.0  ;;  %v2707_v12 = vpop.f32.mrb[106].mxu0 }
 0x58d   :  { %v1581_v14 = vadd.f32 %v2707_v12, %v3595_v27  ;;  %v1575_v15 = vpop.f32.mrb[107].mxu0 }
 0x58e   :  { %v1576_v16 = vadd.f32 %v3595_v27, %v1575_v15  ;;  %2782 = vmatprep.mubr.f32.mxu1 %v1692_v10 }
 0x58f   :  { %2783 = vmatmul.mubr.f32.gmra.mrb[104].mxu1 %v1693_v13  ;;  %v1695_v11 = vmax.f32 %v1581_v14, 0.0 }
 0x590   :  { %v1694_v21 = vmax.f32 %v1576_v16, 0.0 }
 0x592   :  { %2785 = vmatprep.mubr.f32.mxu1 %v1694_v21 }
 0x593   :  { %2786 = vmatmul.mubr.f32.gmra.mrb[106].mxu1 %v1695_v11 }
 0x598   :  { %v2710_v25 = vpop.f32.mrb[108].mxu0 }
 0x599   :  { %v1591_v3 = vadd.f32 %v2710_v25, %v3595_v27  ;;  %v1585_v47 = vpop.f32.mrb[109].mxu0 }
 0x59a   :  { %v1586_v2 = vadd.f32 %v3595_v27, %v1585_v47 }
 0x59b   :  { %v1697_v57 = vmax.f32 %v1591_v3, 0.0 }
 0x59c   :  { %v1696_v50 = vmax.f32 %v1586_v2, 0.0  ;;  %v2713_v56 = vpop.f32.mrb[110].mxu0 }
 0x59d   :  { %v1601_v58 = vadd.f32 %v2713_v56, %v3595_v27  ;;  %v1595_v59 = vpop.f32.mrb[111].mxu0 }
 0x59e   :  { %v1596_v60 = vadd.f32 %v3595_v27, %v1595_v59  ;;  %2788 = vmatprep.mubr.f32.mxu1 %v1696_v50 }
 0x59f   :  { %2789 = vmatmul.mubr.f32.gmra.mrb[108].mxu1 %v1697_v57  ;;  %v1699_v62 = vmax.f32 %v1601_v58, 0.0 }
 0x5a0   :  { %v1698_v61 = vmax.f32 %v1596_v60, 0.0 }
 0x5a2   :  { %2791 = vmatprep.mubr.f32.mxu1 %v1698_v61 }
 0x5a3   :  { %2792 = vmatmul.mubr.f32.gmra.mrb[110].mxu1 %v1699_v62 }
 0x5a8   :  { %v2716_v63 = vpop.f32.mrb[112].mxu0 }
 0x5a9   :  { %v1611_v4 = vadd.f32 %v2716_v63, %v3595_v27  ;;  %v1605_v5 = vpop.f32.mrb[113].mxu0 }
 0x5aa   :  { %v1606_v23 = vadd.f32 %v3595_v27, %v1605_v5 }
 0x5ab   :  { %v1701_v46 = vmax.f32 %v1611_v4, 0.0 }
 0x5ac   :  { %v1700_v6 = vmax.f32 %v1606_v23, 0.0  ;;  %v2719_v22 = vpop.f32.mrb[114].mxu0 }
 0x5ad   :  { %v1621_v8 = vadd.f32 %v2719_v22, %v3595_v27  ;;  %v1615_v7 = vpop.f32.mrb[115].mxu0 }
 0x5ae   :  { %v1616_v17 = vadd.f32 %v3595_v27, %v1615_v7  ;;  %2794 = vmatprep.mubr.f32.mxu1 %v1700_v6 }
 0x5af   :  { %2795 = vmatmul.mubr.f32.gmra.mrb[112].mxu1 %v1701_v46  ;;  %v1703_v19 = vmax.f32 %v1621_v8, 0.0 }
 0x5b0   :  { %v1702_v18 = vmax.f32 %v1616_v17, 0.0 }
 0x5b2   :  { %2797 = vmatprep.mubr.f32.mxu1 %v1702_v18 }
 0x5b3   :  { %2798 = vmatmul.mubr.f32.gmra.mrb[114].mxu1 %v1703_v19 }
 0x5b8   :  { %v2722_v20 = vpop.f32.mrb[116].mxu0 }
 0x5b9   :  { %v1631_v24 = vadd.f32 %v2722_v20, %v3595_v27  ;;  %v1625_v26 = vpop.f32.mrb[117].mxu0 }
 0x5ba   :  { %v1626_v28 = vadd.f32 %v3595_v27, %v1625_v26 }
 0x5bb   :  { %v1705_v43 = vmax.f32 %v1631_v24, 0.0 }
 0x5bc   :  { %v1704_v29 = vmax.f32 %v1626_v28, 0.0  ;;  %v2725_v30 = vpop.f32.mrb[118].mxu0 }
 0x5bd   :  { %v1641_v31 = vadd.f32 %v2725_v30, %v3595_v27  ;;  %v1635_v32 = vpop.f32.mrb[119].mxu0 }
 0x5be   :  { %v1636_v33 = vadd.f32 %v3595_v27, %v1635_v32  ;;  %2800 = vmatprep.mubr.f32.mxu1 %v1704_v29 }
 0x5bf   :  { %2801 = vmatmul.mubr.f32.gmra.mrb[116].mxu1 %v1705_v43  ;;  %v1707_v35 = vmax.f32 %v1641_v31, 0.0 }
 0x5c0   :  { %v1706_v34 = vmax.f32 %v1636_v33, 0.0 }
 0x5c2   :  { %2803 = vmatprep.mubr.f32.mxu1 %v1706_v34 }
 0x5c3   :  { %2804 = vmatmul.mubr.f32.gmra.mrb[118].mxu1 %v1707_v35 }
 0x5c8   :  { %v2728_v36 = vpop.f32.mrb[120].mxu0 }
 0x5c9   :  { %v1651_v37 = vadd.f32 %v2728_v36, %v3595_v27  ;;  %v1645_v38 = vpop.f32.mrb[121].mxu0 }
 0x5ca   :  { %v1646_v39 = vadd.f32 %v3595_v27, %v1645_v38 }
 0x5cb   :  { %v1709_v42 = vmax.f32 %v1651_v37, 0.0 }
 0x5cc   :  { %v1708_v40 = vmax.f32 %v1646_v39, 0.0  ;;  %v2731_v41 = vpop.f32.mrb[122].mxu0 }
 0x5cd   :  { %v1661_v44 = vadd.f32 %v2731_v41, %v3595_v27  ;;  %v1655_v45 = vpop.f32.mrb[123].mxu0 }
 0x5ce   :  { %v1656_v48 = vadd.f32 %v3595_v27, %v1655_v45  ;;  %2806 = vmatprep.mubr.f32.mxu1 %v1708_v40 }
 0x5cf   :  { %2807 = vmatmul.mubr.f32.gmra.mrb[120].mxu1 %v1709_v42  ;;  %v1711_v51 = vmax.f32 %v1661_v44, 0.0 }
 0x5d0   :  { %v1710_v49 = vmax.f32 %v1656_v48, 0.0 }
 0x5d2   :  { %2809 = vmatprep.mubr.f32.mxu1 %v1710_v49 }
 0x5d3   :  { %2810 = vmatmul.mubr.f32.gmra.mrb[122].mxu1 %v1711_v51 }
 0x5d8   :  { %v2734_v52 = vpop.f32.mrb[124].mxu0 }
 0x5d9   :  { %v1671_v53 = vadd.f32 %v2734_v52, %v3595_v27  ;;  %v1665_v54 = vpop.f32.mrb[125].mxu0 }
 0x5da   :  { %v1666_v55 = vadd.f32 %v3595_v27, %v1665_v54 }
 0x5db   :  { %v1713_v9 = vmax.f32 %v1671_v53, 0.0 }
 0x5dc   :  { %v1712_v0 = vmax.f32 %v1666_v55, 0.0  ;;  %v2737_v1 = vpop.f32.mrb[126].mxu0 }
 0x5dd   :  { %v1681_v10 = vadd.f32 %v2737_v1, %v3595_v27  ;;  %v1675_v12 = vpop.f32.mrb[127].mxu0 }
 0x5de   :  { %v1676_v13 = vadd.f32 %v3595_v27, %v1675_v12  ;;  %2812 = vmatprep.mubr.f32.mxu1 %v1712_v0 }
 0x5df   :  { %2813 = vmatmul.mubr.f32.gmra.mrb[124].mxu1 %v1713_v9  ;;  %v1715_v15 = vmax.f32 %v1681_v10, 0.0 }
 0x5e0   :  { %v1714_v14 = vmax.f32 %v1676_v13, 0.0 }
 0x5e2   :  { %2815 = vmatprep.mubr.f32.mxu1 %v1714_v14 }
 0x5e3   :  { %2816 = vmatmul.mubr.f32.gmra.mrb[126].mxu1 %v1715_v15 }
 0x5e4   :  { %3140 = shalt.err (!%p3137_p4)
}
 0x5e5   :  { %s3141_s25 = scalar_lea.hbm %s3708_s12, 4096 }
 0x5e6   :  { %p3142_p5 = scmp.ne.s32.totalorder %s3708_s12, %s3141_s25  ;;  %p3145_p6 = scmp.lt.u32.totalorder %s3141_s25, %s3708_s12 }
 0x5e8   :  { %p3147_p7 = pnand %p3145_p6, %p3142_p5 }
 0x5ea   :  { %3150 = shalt.err (!%p3147_p7)
}
 0x5eb   :  { %2035 = dma.vmem_to_hbm [thread:$0]  %s2030_s19, 4096, %s3708_s12, [#allocation16], %s3191_s7, %s3191_s7, %s3192_s20  }
 0x5ec   :  { %v3647_v27 = vld [vmem:[%s3706_s10] ss:$0 sm:$0xff]  ;;  %s3197_s10 = smov [#allocation14]  }
 0x5ed   :  { %s2017_s12 = sshll.u32 %s3197_s10, 4  ;;  %s2018_s12 = int_to_ptr.vmem [resolvable:$true] %s2017_s12 }
 0x5ee   :  { %s3151_s26 = scalar_lea.vmem %s2018_s12, 4096  ;;  %p3156_p9 = scmp.lt.s32.totalorder %s2018_s12, %s2018_s12 }
 0x5ef   :  { %p3152_p8 = scmp.ne.s32.totalorder %s2018_s12, %s3151_s26  ;;  %p3157_p10 = scmp.lt.s32.totalorder %s3151_s26, %s3151_s26 }
 0x5f1   :  { %p3158_p11 = por %p3157_p10, %p3156_p9 }
 0x5f3   :  { %p3159_p12 = pnand %p3158_p11, %p3152_p8 }
 0x642   :  { %v2772_v16 = vpop.f32.mrb[96].mxu1 }
 0x643   :  { %v1827_v21 = vadd.f32 %v2772_v16, %v3647_v27  ;;  %v1821_v11 = vpop.f32.mrb[97].mxu1 }
 0x644   :  { %v1822_v25 = vadd.f32 %v3647_v27, %v1821_v11 }
 0x645   :  { %1981 = vst [vmem:[#allocation14 + $0x8] sm:$0xff] %v1827_v21 }
 0x646   :  { %1980 = vst [vmem:[#allocation14] sm:$0xff] %v1822_v25  ;;  %v2775_v3 = vpop.f32.mrb[98].mxu1 }
 0x647   :  { %v1837_v47 = vadd.f32 %v2775_v3, %v3647_v27  ;;  %v1831_v2 = vpop.f32.mrb[99].mxu1 }
 0x648   :  { %v1832_v50 = vadd.f32 %v3647_v27, %v1831_v2 }
 0x649   :  { %1983 = vst [vmem:[#allocation14 + $0x18] sm:$0xff] %v1837_v47 }
 0x64a   :  { %1982 = vst [vmem:[#allocation14 + $0x10] sm:$0xff] %v1832_v50 }
 0x652   :  { %v2778_v56 = vpop.f32.mrb[100].mxu1 }
 0x653   :  { %v1847_v57 = vadd.f32 %v2778_v56, %v3647_v27  ;;  %v1841_v58 = vpop.f32.mrb[101].mxu1 }
 0x654   :  { %v1842_v59 = vadd.f32 %v3647_v27, %v1841_v58 }
 0x655   :  { %1985 = vst [vmem:[#allocation14 + $0x28] sm:$0xff] %v1847_v57 }
 0x656   :  { %1984 = vst [vmem:[#allocation14 + $0x20] sm:$0xff] %v1842_v59  ;;  %v2781_v60 = vpop.f32.mrb[102].mxu1 }
 0x657   :  { %v1857_v61 = vadd.f32 %v2781_v60, %v3647_v27  ;;  %v1851_v62 = vpop.f32.mrb[103].mxu1 }
 0x658   :  { %v1852_v63 = vadd.f32 %v3647_v27, %v1851_v62 }
 0x659   :  { %1987 = vst [vmem:[#allocation14 + $0x38] sm:$0xff] %v1857_v61 }
 0x65a   :  { %1986 = vst [vmem:[#allocation14 + $0x30] sm:$0xff] %v1852_v63 }
 0x662   :  { %v2784_v4 = vpop.f32.mrb[104].mxu1 }
 0x663   :  { %v1867_v5 = vadd.f32 %v2784_v4, %v3647_v27  ;;  %v1861_v23 = vpop.f32.mrb[105].mxu1 }
 0x664   :  { %v1862_v6 = vadd.f32 %v3647_v27, %v1861_v23 }
 0x665   :  { %1989 = vst [vmem:[#allocation14 + $0x48] sm:$0xff] %v1867_v5 }
 0x666   :  { %1988 = vst [vmem:[#allocation14 + $0x40] sm:$0xff] %v1862_v6  ;;  %v2787_v22 = vpop.f32.mrb[106].mxu1 }
 0x667   :  { %v1877_v46 = vadd.f32 %v2787_v22, %v3647_v27  ;;  %v1871_v8 = vpop.f32.mrb[107].mxu1 }
 0x668   :  { %v1872_v7 = vadd.f32 %v3647_v27, %v1871_v8 }
 0x669   :  { %1991 = vst [vmem:[#allocation14 + $0x58] sm:$0xff] %v1877_v46 }
 0x66a   :  { %1990 = vst [vmem:[#allocation14 + $0x50] sm:$0xff] %v1872_v7 }
 0x672   :  { %v2790_v17 = vpop.f32.mrb[108].mxu1 }
 0x673   :  { %v1887_v18 = vadd.f32 %v2790_v17, %v3647_v27  ;;  %v1881_v19 = vpop.f32.mrb[109].mxu1 }
 0x674   :  { %v1882_v20 = vadd.f32 %v3647_v27, %v1881_v19 }
 0x675   :  { %1993 = vst [vmem:[#allocation14 + $0x68] sm:$0xff] %v1887_v18 }
 0x676   :  { %1992 = vst [vmem:[#allocation14 + $0x60] sm:$0xff] %v1882_v20  ;;  %v2793_v24 = vpop.f32.mrb[110].mxu1 }
 0x677   :  { %v1897_v26 = vadd.f32 %v2793_v24, %v3647_v27  ;;  %v1891_v28 = vpop.f32.mrb[111].mxu1 }
 0x678   :  { %v1892_v29 = vadd.f32 %v3647_v27, %v1891_v28 }
 0x679   :  { %1995 = vst [vmem:[#allocation14 + $0x78] sm:$0xff] %v1897_v26 }
 0x67a   :  { %1994 = vst [vmem:[#allocation14 + $0x70] sm:$0xff] %v1892_v29 }
 0x682   :  { %v2796_v30 = vpop.f32.mrb[112].mxu1 }
 0x683   :  { %v1907_v43 = vadd.f32 %v2796_v30, %v3647_v27  ;;  %v1901_v31 = vpop.f32.mrb[113].mxu1 }
 0x684   :  { %v1902_v32 = vadd.f32 %v3647_v27, %v1901_v31 }
 0x685   :  { %1997 = vst [vmem:[#allocation14 + $0x88] sm:$0xff] %v1907_v43 }
 0x686   :  { %1996 = vst [vmem:[#allocation14 + $0x80] sm:$0xff] %v1902_v32  ;;  %v2799_v33 = vpop.f32.mrb[114].mxu1 }
 0x687   :  { %v1917_v34 = vadd.f32 %v2799_v33, %v3647_v27  ;;  %v1911_v35 = vpop.f32.mrb[115].mxu1 }
 0x688   :  { %v1912_v36 = vadd.f32 %v3647_v27, %v1911_v35 }
 0x689   :  { %1999 = vst [vmem:[#allocation14 + $0x98] sm:$0xff] %v1917_v34 }
 0x68a   :  { %1998 = vst [vmem:[#allocation14 + $0x90] sm:$0xff] %v1912_v36 }
 0x692   :  { %v2802_v37 = vpop.f32.mrb[116].mxu1 }
 0x693   :  { %v1927_v38 = vadd.f32 %v2802_v37, %v3647_v27  ;;  %v1921_v39 = vpop.f32.mrb[117].mxu1 }
 0x694   :  { %v1922_v40 = vadd.f32 %v3647_v27, %v1921_v39 }
 0x695   :  { %2001 = vst [vmem:[#allocation14 + $0xa8] sm:$0xff] %v1927_v38 }
 0x696   :  { %2000 = vst [vmem:[#allocation14 + $0xa0] sm:$0xff] %v1922_v40  ;;  %v2805_v41 = vpop.f32.mrb[118].mxu1 }
 0x697   :  { %v1937_v42 = vadd.f32 %v2805_v41, %v3647_v27  ;;  %v1931_v44 = vpop.f32.mrb[119].mxu1 }
 0x698   :  { %v1932_v45 = vadd.f32 %v3647_v27, %v1931_v44 }
 0x699   :  { %2003 = vst [vmem:[#allocation14 + $0xb8] sm:$0xff] %v1937_v42 }
 0x69a   :  { %2002 = vst [vmem:[#allocation14 + $0xb0] sm:$0xff] %v1932_v45 }
 0x6a2   :  { %v2808_v48 = vpop.f32.mrb[120].mxu1 }
 0x6a3   :  { %v1947_v49 = vadd.f32 %v2808_v48, %v3647_v27  ;;  %v1941_v51 = vpop.f32.mrb[121].mxu1 }
 0x6a4   :  { %v1942_v52 = vadd.f32 %v3647_v27, %v1941_v51 }
 0x6a5   :  { %2005 = vst [vmem:[#allocation14 + $0xc8] sm:$0xff] %v1947_v49 }
 0x6a6   :  { %2004 = vst [vmem:[#allocation14 + $0xc0] sm:$0xff] %v1942_v52  ;;  %v2811_v53 = vpop.f32.mrb[122].mxu1 }
 0x6a7   :  { %v1957_v54 = vadd.f32 %v2811_v53, %v3647_v27  ;;  %v1951_v55 = vpop.f32.mrb[123].mxu1 }
 0x6a8   :  { %v1952_v0 = vadd.f32 %v3647_v27, %v1951_v55 }
 0x6a9   :  { %2007 = vst [vmem:[#allocation14 + $0xd8] sm:$0xff] %v1957_v54 }
 0x6aa   :  { %2006 = vst [vmem:[#allocation14 + $0xd0] sm:$0xff] %v1952_v0 }
 0x6b2   :  { %v2814_v1 = vpop.f32.mrb[124].mxu1 }
 0x6b3   :  { %v1967_v9 = vadd.f32 %v2814_v1, %v3647_v27  ;;  %v1961_v10 = vpop.f32.mrb[125].mxu1 }
 0x6b4   :  { %v1962_v12 = vadd.f32 %v3647_v27, %v1961_v10 }
 0x6b5   :  { %2009 = vst [vmem:[#allocation14 + $0xe8] sm:$0xff] %v1967_v9 }
 0x6b6   :  { %2008 = vst [vmem:[#allocation14 + $0xe0] sm:$0xff] %v1962_v12  ;;  %v2817_v13 = vpop.f32.mrb[126].mxu1 }
 0x6b7   :  { %v1977_v14 = vadd.f32 %v2817_v13, %v3647_v27  ;;  %v1971_v15 = vpop.f32.mrb[127].mxu1 }
 0x6b8   :  { %v1972_v16 = vadd.f32 %v3647_v27, %v1971_v15 }
 0x6b9   :  { %2011 = vst [vmem:[#allocation14 + $0xf8] sm:$0xff] %v1977_v14 }
 0x6ba   :  { %2010 = vst [vmem:[#allocation14 + $0xf0] sm:$0xff] %v1972_v16 }
 0x6bb   :  { %3162 = shalt.err (!%p3159_p12)
}
 0x6bc   :  { %s3163_s16 = scalar_lea.hbm %s3707_s11, 4096 }
 0x6bd   :  { %p3164_p13 = scmp.ne.s32.totalorder %s3707_s11, %s3163_s16  ;;  %p3167_p0 = scmp.lt.u32.totalorder %s3163_s16, %s3707_s11 }
 0x6bf   :  { %p3169_p1 = pnand %p3167_p0, %p3164_p13 }
 0x6c1   :  { %3172 = shalt.err (!%p3169_p1)
}
 0x6c2   :  { %2023 = dma.vmem_to_hbm [thread:$0]  %s2018_s12, 4096, %s3707_s11, [#allocation4], %s3191_s7, %s3191_s7, %s3192_s20  }
 0x6c3   :  { %3181 = dma.done.wait [#allocation4], 4096  }
 0x6c4   :  { %3182 = vsyncadd [#allocation4], 4294963200 }
 0x6c5   :  { %3183 = dma.done.wait [#allocation16], 4096  }
 0x6c6   :  { %3184 = vsyncadd [#allocation16], 4294963200 }
 0x6c7   :  { %2042 = vsyncpa [#allocation3], 1 }
 0x6c8   :  { %2043 = vsyncpa [#allocation6], 1 }
 0x6c9   :  { %2044 = vsyncpa [#allocation9], 1 }
 0x6ca   :  { %2045 = vsyncpa [#allocation12], 1 }
 0x6cb   :  { %2046 = vsyncpa [#allocation4], 1 }
 0x6cc   :  { %2047 = vsyncpa [#allocation16], 1 }

</bundles_post_ra>
